<compile_context>
chip_gen: v7x
topology: tpu7x:2x2x1
jax: 0.10.0
libtpu: 0.0.40
codegen_flags: <defaults>
</compile_context>

<pallas_src>
import functools

import jax
import jax.numpy as jnp
import numpy as np
from jax import lax
from jax.experimental import pallas as pl
from jax.experimental.pallas import tpu as pltpu

_NEG_BIG = -1e9     # masks entries out of the log-sum-exp (exp underflows to 0)
_M_INIT = -1e30     # initial running max


def _round_up(x, m):
    return (x + m - 1) // m * m


def _fa_supcon_kernel(feat_r_ref, feat_c_ref, lab_col_ref, lab_row_ref,
                      row_keep_ref, col_valid_ref,
                      loss_ref,
                      m_ref, l_ref, cnt_ref, ml_ref,
                      *, inv_temp, loss_scale, block_rows, block_cols,
                      apply_col_mask):
    """One (row_block, col_block) tile of the FA-SupCon loss.

    feat_r_ref:    [TR, D] bf16  anchor features for this row block
    feat_c_ref:    [TC, D] bf16  contrast features for this column block
    lab_col_ref:   [TR, 1] i32   anchor labels (rows)
    lab_row_ref:   [1, TC] i32   contrast labels (columns)
    row_keep_ref:  [TR, 1] f32   few-shot gate * row validity (0/1)
    col_valid_ref: [1, TC] f32   column validity (0 for padded columns)
    loss_ref:      [TR, 1] f32   per-anchor loss (written at last column block)
    m/l/cnt/ml:    [TR, 1] f32   VMEM scratch accumulators
    """
    ri = pl.program_id(0)
    ci = pl.program_id(1)
    n_col_blocks = pl.num_programs(1)

    @pl.when(ci == 0)
    def _init():
        m_ref[...] = jnp.full((block_rows, 1), _M_INIT, jnp.float32)
        l_ref[...] = jnp.zeros((block_rows, 1), jnp.float32)
        cnt_ref[...] = jnp.zeros((block_rows, 1), jnp.float32)
        ml_ref[...] = jnp.zeros((block_rows, 1), jnp.float32)

    # Gram tile on the MXU: bf16 x bf16 -> f32 accumulation.
    adc = lax.dot_general(
        feat_r_ref[...], feat_c_ref[...],
        dimension_numbers=(((1,), (1,)), ((), ())),
        preferred_element_type=jnp.float32,
    ) * inv_temp                                              # [TR, TC]

    lab_eq = lab_col_ref[...] == lab_row_ref[...]             # [TR, TC] bool
    row_keep = row_keep_ref[...]                              # [TR, 1]
    if apply_col_mask:
        col_valid = col_valid_ref[...]                        # [1, TC]
        col_bias = (1.0 - col_valid) * _NEG_BIG               # 0 valid / -1e9 pad
    else:
        col_valid = None
        col_bias = None

    def _accumulate(touch_diag):
        if touch_diag:
            rows_g = ri * block_rows + lax.broadcasted_iota(
                jnp.int32, (block_rows, block_cols), 0)
            cols_g = ci * block_cols + lax.broadcasted_iota(
                jnp.int32, (block_rows, block_cols), 1)
            not_diag = rows_g != cols_g
            pos_b = jnp.logical_and(lab_eq, not_diag)
        else:
            not_diag = None
            pos_b = lab_eq

        if apply_col_mask:
            s = adc + col_bias                                # kill padded cols
            pos = jnp.where(pos_b, col_valid, 0.0)
        else:
            s = adc
            pos = pos_b.astype(jnp.float32)
        if touch_diag:
            s = jnp.where(not_diag, s, _NEG_BIG)              # kill self-contrast
        pos = pos * row_keep                                  # O(N) few-shot gate

        # Streaming log-sum-exp over the masked columns (flash-style).
        m_prev = m_ref[...]
        m_new = jnp.maximum(m_prev, jnp.max(s, axis=1, keepdims=True))
        alpha = jnp.exp(m_prev - m_new)
        l_ref[...] = alpha * l_ref[...] + jnp.sum(
            jnp.exp(s - m_new), axis=1, keepdims=True)
        m_ref[...] = m_new

        cnt_ref[...] += jnp.sum(pos, axis=1, keepdims=True)
        ml_ref[...] += jnp.sum(pos * adc, axis=1, keepdims=True)

    row_start = ri * block_rows
    col_start = ci * block_cols
    touches_diag = jnp.logical_and(row_start < col_start + block_cols,
                                   col_start < row_start + block_rows)

    @pl.when(touches_diag)
    def _diag_tile():
        _accumulate(True)

    @pl.when(jnp.logical_not(touches_diag))
    def _off_diag_tile():
        _accumulate(False)

    @pl.when(ci == n_col_blocks - 1)
    def _finalize():
        lse = m_ref[...] + jnp.log(l_ref[...])                # true row LSE
        cnt = cnt_ref[...]
        mpp = jnp.where(cnt < 1e-6, 1.0, cnt)
        mean_lpp = (ml_ref[...] - cnt * lse) * pl.reciprocal(mpp, approx=True)
        loss_ref[...] = (-loss_scale) * mean_lpp


def fa_supcon_loss(features, labels, sources, *,
                   temperature=0.07, contrast_mode='all', base_temperature=0.07,
                   block_rows=256, block_cols=512):
    """JAX/Pallas port of FASupConLoss.forward (labels path, contrast_mode='all')."""
    if features.ndim < 3:
        raise ValueError('`features` needs to be [bsz, n_views, ...]')
    if contrast_mode != 'all':
        # TODO(synk): contrast_mode='one' (anchor = first view only) not wired up.
        raise ValueError('Only contrast_mode="all" is implemented')
    if labels is None:
        # TODO(synk): labels=None / explicit-mask SimCLR path not wired up.
        raise ValueError('labels is required in this implementation')

    bsz, n_views = features.shape[0], features.shape[1]
    feat = features.reshape(bsz, n_views, -1)
    D = feat.shape[-1]
    N = n_views * bsz

    # contrast_feature = torch.cat(torch.unbind(features, dim=1), dim=0); bf16 for MXU.
    cf = jnp.transpose(feat, (1, 0, 2)).reshape(N, D).astype(jnp.bfloat16)

    labels_t = jnp.tile(labels.reshape(-1).astype(jnp.int32), (n_views,))    # [N]
    sources_b = sources.reshape(-1).astype(jnp.float32)                      # [bsz]
    fewshot_ct = jnp.sum(sources_b)
    has_fewshot = fewshot_ct > 0.0
    # Few-shot gate folded into an O(N) per-row vector (no [N,N] select).
    row_keep_b = jnp.where(has_fewshot,
                           (sources_b > 0.0).astype(jnp.float32),
                           jnp.ones_like(sources_b))
    row_keep = jnp.tile(row_keep_b, (n_views,))                              # [N]

    # --- tiling / lane-aligned padding ---
    n128 = _round_up(N, 128)
    tc = min(block_cols, n128)
    tr = min(block_rows, n128)
    if tc % tr != 0:
        tc = tr
    n_pad = _round_up(N, max(tr, tc))
    pad = n_pad - N
    apply_col_mask = pad > 0

    cf_p = jnp.pad(cf, ((0, pad), (0, 0)))
    lab_p = jnp.pad(labels_t, (0, pad))
    lab_col = lab_p.reshape(n_pad, 1)
    lab_row = lab_p.reshape(1, n_pad)
    row_keep_p = jnp.pad(row_keep, (0, pad)).reshape(n_pad, 1)   # padded rows -> 0
    col_valid = jnp.pad(jnp.ones((N,), jnp.float32), (0, pad)).reshape(1, n_pad)

    n_rb = n_pad // tr
    n_cb = n_pad // tc

    kernel = functools.partial(
        _fa_supcon_kernel,
        inv_temp=1.0 / float(temperature),
        loss_scale=float(temperature) / float(base_temperature),
        block_rows=tr, block_cols=tc,
        apply_col_mask=apply_col_mask,
    )

    grid_spec = pltpu.PrefetchScalarGridSpec(
        num_scalar_prefetch=0,
        grid=(n_rb, n_cb),
        in_specs=[
            pl.BlockSpec((tr, D), lambda ri, ci: (ri, 0)),   # anchor rows
            pl.BlockSpec((tc, D), lambda ri, ci: (ci, 0)),   # contrast columns
            pl.BlockSpec((tr, 1), lambda ri, ci: (ri, 0)),   # labels (rows)
            pl.BlockSpec((1, tc), lambda ri, ci: (0, ci)),   # labels (cols)
            pl.BlockSpec((tr, 1), lambda ri, ci: (ri, 0)),   # few-shot/row gate
            pl.BlockSpec((1, tc), lambda ri, ci: (0, ci)),   # column validity
        ],
        out_specs=pl.BlockSpec((tr, 1), lambda ri, ci: (ri, 0)),
        scratch_shapes=[pltpu.VMEM((tr, 1), jnp.float32)] * 4,
    )

    cost = pl.CostEstimate(
        flops=int(2 * n_pad * n_pad * D + 12 * n_pad * n_pad),
        transcendentals=int(n_pad * n_pad + 4 * n_pad),
        bytes_accessed=int(2 * D * n_pad * (n_rb + n_cb) + 24 * n_pad),
    )

    loss_rows = pl.pallas_call(
        kernel,
        out_shape=jax.ShapeDtypeStruct((n_pad, 1), jnp.float32),
        grid_spec=grid_spec,
        compiler_params=pltpu.CompilerParams(
            dimension_semantics=("parallel", "arbitrary"),
            vmem_limit_bytes=32 * 1024 * 1024),
        cost_estimate=cost,
    )(cf_p, cf_p, lab_col, lab_row, row_keep_p, col_valid)

    loss_sum = jnp.sum(loss_rows)          # padded rows contribute exactly 0
    denom = jnp.where(has_fewshot, fewshot_ct, jnp.asarray(float(N), jnp.float32))
    return loss_sum / denom, fewshot_ct


def _reference_jax(features, labels, sources, temperature=0.07, base_temperature=0.07):
    """Pure-JAX f32 reference mirroring the PyTorch code (labels path, mode='all')."""
    bsz, n_views = features.shape[0], features.shape[1]
    feat = features.reshape(bsz, n_views, -1).astype(jnp.float32)
    fewshot_ct = jnp.sum(sources.astype(jnp.float32))
    has_fewshot = fewshot_ct > 0

    mask = (labels.reshape(-1, 1) == labels.reshape(1, -1)).astype(jnp.float32)
    mask = jnp.where(has_fewshot,
                     mask * (sources.reshape(-1, 1) > 0).astype(jnp.float32),
                     mask)

    cf = jnp.transpose(feat, (1, 0, 2)).reshape(n_views * bsz, -1)
    adc = (cf @ cf.T) / temperature
    logits = adc - jnp.max(adc, axis=1, keepdims=True)
    mask = jnp.tile(mask, (n_views, n_views))
    logits_mask = 1.0 - jnp.eye(n_views * bsz, dtype=jnp.float32)
    mask = mask * logits_mask
    exp_logits = jnp.exp(logits) * logits_mask
    log_prob = logits - jnp.log(exp_logits.sum(1, keepdims=True))
    mpp = mask.sum(1)
    mpp = jnp.where(mpp < 1e-6, 1.0, mpp)
    mean_lpp = (mask * log_prob).sum(1) / mpp
    loss = -(temperature / base_temperature) * mean_lpp
    loss = jnp.where(has_fewshot,
                     loss.sum() / jnp.where(has_fewshot, fewshot_ct, 1.0),
                     loss.mean())
    return loss, fewshot_ct


if __name__ == "__main__":
    key = jax.random.PRNGKey(0)
    k1, k2, k3 = jax.random.split(key, 3)

    # ---- Test 1: small batch, mixed few-shot sources (single-tile path) ----
    bsz, n_views, dim = 8, 2, 32
    feats = jax.random.normal(k1, (bsz, n_views, dim), dtype=jnp.float32)
    feats = feats / jnp.linalg.norm(feats, axis=-1, keepdims=True)
    # Snap to bf16-representable values so kernel (bf16 MXU) and f32 reference agree.
    feats = feats.astype(jnp.bfloat16).astype(jnp.float32)
    labels = jax.random.randint(k2, (bsz,), 0, 4, dtype=jnp.int32)
    sources = jnp.array([1, 0, 1, 1, 0, 0, 1, 0], dtype=jnp.float32)

    loss, fsct = fa_supcon_loss(feats, labels, sources)
    loss = jax.block_until_ready(loss)
    fsct = jax.block_until_ready(fsct)
    ref_loss, ref_fsct = _reference_jax(feats, labels, sources)
    np.testing.assert_allclose(np.asarray(loss), np.asarray(ref_loss), rtol=2e-2, atol=2e-2)
    np.testing.assert_allclose(np.asarray(fsct), np.asarray(ref_fsct), rtol=1e-6, atol=1e-6)

    # ---- Test 2: no few-shot sources (mean path) ----
    sources0 = jnp.zeros((bsz,), dtype=jnp.float32)
    loss0, _ = fa_supcon_loss(feats, labels, sources0)
    loss0 = jax.block_until_ready(loss0)
    ref_loss0, _ = _reference_jax(feats, labels, sources0)
    np.testing.assert_allclose(np.asarray(loss0), np.asarray(ref_loss0), rtol=2e-2, atol=2e-2)

    # ---- Test 3: multi-tile grid with row/col padding (N=192 -> 256, 2x2 grid) ----
    b2, v2, d2 = 96, 2, 32
    f2 = jax.random.normal(jax.random.PRNGKey(7), (b2, v2, d2), dtype=jnp.float32)
    f2 = f2 / jnp.linalg.norm(f2, axis=-1, keepdims=True)
    f2 = f2.astype(jnp.bfloat16).astype(jnp.float32)
    l2 = jax.random.randint(jax.random.PRNGKey(8), (b2,), 0, 10, dtype=jnp.int32)
    s2 = (jax.random.uniform(jax.random.PRNGKey(9), (b2,)) > 0.5).astype(jnp.float32)
    loss2, fsct2 = fa_supcon_loss(f2, l2, s2, block_rows=128, block_cols=128)
    loss2 = jax.block_until_ready(loss2)
    ref2, reff2 = _reference_jax(f2, l2, s2)
    np.testing.assert_allclose(np.asarray(loss2), np.asarray(ref2), rtol=2e-2, atol=2e-2)
    np.testing.assert_allclose(np.asarray(fsct2), np.asarray(reff2), rtol=1e-6, atol=1e-6)

    print("KERNEL_OK")
</pallas_src>

<mosaic_0001>
module attributes {stable_mosaic.version = 11 : i64} {
  func.func @_fa_supcon_kernel(%arg0: i32, %arg1: i32, %arg2: memref<128x32xbf16, #tpu.memory_space<vmem>>, %arg3: memref<128x32xbf16, #tpu.memory_space<vmem>>, %arg4: memref<128x1xi32, #tpu.memory_space<vmem>>, %arg5: memref<1x128xi32, #tpu.memory_space<vmem>>, %arg6: memref<128x1xf32, #tpu.memory_space<vmem>>, %arg7: memref<1x128xf32, #tpu.memory_space<vmem>>, %arg8: memref<128x1xf32, #tpu.memory_space<vmem>>, %arg9: memref<128x1xf32, #tpu.memory_space<vmem>>, %arg10: memref<128x1xf32, #tpu.memory_space<vmem>>, %arg11: memref<128x1xf32, #tpu.memory_space<vmem>>, %arg12: memref<128x1xf32, #tpu.memory_space<vmem>>) attributes {dimension_semantics = [#tpu.dimension_semantics<parallel>, #tpu.dimension_semantics<arbitrary>], iteration_bounds = array<i64: 1, 1>, scalar_prefetch = 0 : i64, scratch_operands = 4 : i64, tpu.core_type = #tpu.core_type<tc>, window_params = [{transform_indices = @transform_0, window_bounds = array<i64: 128, 32>}, {transform_indices = @transform_1, window_bounds = array<i64: 128, 32>}, {transform_indices = @transform_2, window_bounds = array<i64: 128, 1>}, {transform_indices = @transform_3, window_bounds = array<i64: 1, 128>}, {transform_indices = @transform_4, window_bounds = array<i64: 128, 1>}, {transform_indices = @transform_5, window_bounds = array<i64: 1, 128>}, {transform_indices = @transform_6, window_bounds = array<i64: 128, 1>}]} {
    %c0_i32 = arith.constant 0 : i32
    %0 = arith.cmpi eq, %arg1, %c0_i32 : i32
    %1 = arith.extui %0 : i1 to i32
    %c0_i32_0 = arith.constant 0 : i32
    %2 = arith.cmpi ne, %1, %c0_i32_0 : i32
    scf.if %2 {
      %cst_22 = arith.constant -1.000000e+30 : f32
      %34 = vector.broadcast %cst_22 : f32 to vector<128x1xf32>
      %c0_23 = arith.constant 0 : index
      %c0_24 = arith.constant 0 : index
      %35 = vector.load %arg9[%c0_23, %c0_24] : memref<128x1xf32, #tpu.memory_space<vmem>>, vector<128x1xf32>
      tpu.vector_store %arg9[%c0_23, %c0_24], %34 {strides = array<i32>} : memref<128x1xf32, #tpu.memory_space<vmem>>, vector<128x1xf32>,
      %cst_25 = arith.constant 0.000000e+00 : f32
      %36 = vector.broadcast %cst_25 : f32 to vector<128x1xf32>
      %c0_26 = arith.constant 0 : index
      %c0_27 = arith.constant 0 : index
      %37 = vector.load %arg10[%c0_26, %c0_27] : memref<128x1xf32, #tpu.memory_space<vmem>>, vector<128x1xf32>
      tpu.vector_store %arg10[%c0_26, %c0_27], %36 {strides = array<i32>} : memref<128x1xf32, #tpu.memory_space<vmem>>, vector<128x1xf32>,
      %cst_28 = arith.constant 0.000000e+00 : f32
      %38 = vector.broadcast %cst_28 : f32 to vector<128x1xf32>
      %c0_29 = arith.constant 0 : index
      %c0_30 = arith.constant 0 : index
      %39 = vector.load %arg11[%c0_29, %c0_30] : memref<128x1xf32, #tpu.memory_space<vmem>>, vector<128x1xf32>
      tpu.vector_store %arg11[%c0_29, %c0_30], %38 {strides = array<i32>} : memref<128x1xf32, #tpu.memory_space<vmem>>, vector<128x1xf32>,
      %cst_31 = arith.constant 0.000000e+00 : f32
      %40 = vector.broadcast %cst_31 : f32 to vector<128x1xf32>
      %c0_32 = arith.constant 0 : index
      %c0_33 = arith.constant 0 : index
      %41 = vector.load %arg12[%c0_32, %c0_33] : memref<128x1xf32, #tpu.memory_space<vmem>>, vector<128x1xf32>
      tpu.vector_store %arg12[%c0_32, %c0_33], %40 {strides = array<i32>} : memref<128x1xf32, #tpu.memory_space<vmem>>, vector<128x1xf32>,
    } else {
    }
    %c0 = arith.constant 0 : index
    %c0_1 = arith.constant 0 : index
    %3 = vector.load %arg2[%c0, %c0_1] : memref<128x32xbf16, #tpu.memory_space<vmem>>, vector<128x32xbf16>
    %c0_2 = arith.constant 0 : index
    %c0_3 = arith.constant 0 : index
    %4 = vector.load %arg3[%c0_2, %c0_3] : memref<128x32xbf16, #tpu.memory_space<vmem>>, vector<128x32xbf16>
    %cst = arith.constant dense<0.000000e+00> : vector<128x128xf32>
    %5 = tpu.matmul %3, %4, %cst {dimension_numbers = #tpu.dot_dimension_numbers<[1], [1], [0], [0], [0, 0, 1, 0], [], []>} : vector<128x32xbf16>, vector<128x32xbf16>, vector<128x128xf32> -> vector<128x128xf32>
    %cst_4 = arith.constant 14.2857141 : f32
    %6 = vector.broadcast %cst_4 : f32 to vector<128x128xf32>
    %7 = arith.mulf %5, %6 : vector<128x128xf32>
    %c0_5 = arith.constant 0 : index
    %c0_6 = arith.constant 0 : index
    %8 = vector.load %arg4[%c0_5, %c0_6] : memref<128x1xi32, #tpu.memory_space<vmem>>, vector<128x1xi32>
    %c0_7 = arith.constant 0 : index
    %c0_8 = arith.constant 0 : index
    %9 = vector.load %arg5[%c0_7, %c0_8] : memref<1x128xi32, #tpu.memory_space<vmem>>, vector<1x128xi32>
    %10 = vector.broadcast %8 : vector<128x1xi32> to vector<128x128xi32>
    %11 = vector.broadcast %9 : vector<1x128xi32> to vector<128x128xi32>
    %12 = arith.cmpi eq, %10, %11 : vector<128x128xi32>
    %c0_9 = arith.constant 0 : index
    %c0_10 = arith.constant 0 : index
    %13 = vector.load %arg6[%c0_9, %c0_10] : memref<128x1xf32, #tpu.memory_space<vmem>>, vector<128x1xf32>
    %c0_11 = arith.constant 0 : index
    %c0_12 = arith.constant 0 : index
    %14 = vector.load %arg7[%c0_11, %c0_12] : memref<1x128xf32, #tpu.memory_space<vmem>>, vector<1x128xf32>
    %cst_13 = arith.constant 1.000000e+00 : f32
    %15 = vector.broadcast %cst_13 : f32 to vector<1x128xf32>
    %16 = arith.subf %15, %14 : vector<1x128xf32>
    %cst_14 = arith.constant -1.000000e+09 : f32
    %17 = vector.broadcast %cst_14 : f32 to vector<1x128xf32>
    %18 = arith.mulf %16, %17 : vector<1x128xf32>
    %c128_i32 = arith.constant 128 : i32
    %19 = arith.muli %arg0, %c128_i32 : i32
    %c128_i32_15 = arith.constant 128 : i32
    %20 = arith.muli %arg1, %c128_i32_15 : i32
    %c128_i32_16 = arith.constant 128 : i32
    %21 = arith.addi %20, %c128_i32_16 : i32
    %22 = arith.cmpi slt, %19, %21 : i32
    %c128_i32_17 = arith.constant 128 : i32
    %23 = arith.addi %19, %c128_i32_17 : i32
    %24 = arith.cmpi slt, %20, %23 : i32
    %25 = arith.andi %22, %24 : i1
    %26 = arith.extui %25 : i1 to i32
    %c0_i32_18 = arith.constant 0 : i32
    %27 = arith.cmpi ne, %26, %c0_i32_18 : i32
    scf.if %27 {
      %c128_i32_22 = arith.constant 128 : i32
      %34 = arith.muli %arg0, %c128_i32_22 : i32
      %35 = tpu.iota {dimensions = array<i32: 0>} : vector<128x128xi32>
      %36 = vector.broadcast %34 : i32 to vector<128x128xi32>
      %37 = arith.addi %36, %35 : vector<128x128xi32>
      %c128_i32_23 = arith.constant 128 : i32
      %38 = arith.muli %arg1, %c128_i32_23 : i32
      %39 = tpu.iota {dimensions = array<i32: 1>} : vector<128x128xi32>
      %40 = vector.broadcast %38 : i32 to vector<128x128xi32>
      %41 = arith.addi %40, %39 : vector<128x128xi32>
      %42 = arith.cmpi ne, %37, %41 : vector<128x128xi32>
      %43 = arith.andi %12, %42 : vector<128x128xi1>
      %44 = vector.broadcast %18 : vector<1x128xf32> to vector<128x128xf32>
      %45 = arith.addf %7, %44 : vector<128x128xf32>
      %cst_24 = arith.constant 0.000000e+00 : f32
      %46 = vector.shape_cast %14 : vector<1x128xf32> to vector<1x128xf32>
      %47 = vector.broadcast %46 : vector<1x128xf32> to vector<128x128xf32>
      %48 = vector.broadcast %cst_24 : f32 to vector<128x128xf32>
      %49 = arith.select %43, %47, %48 : vector<128x128xi1>, vector<128x128xf32>
      %cst_25 = arith.constant -1.000000e+09 : f32
      %50 = vector.broadcast %cst_25 : f32 to vector<128x128xf32>
      %51 = arith.select %42, %45, %50 : vector<128x128xi1>, vector<128x128xf32>
      %52 = vector.broadcast %13 : vector<128x1xf32> to vector<128x128xf32>
      %53 = arith.mulf %49, %52 : vector<128x128xf32>
      %c0_26 = arith.constant 0 : index
      %c0_27 = arith.constant 0 : index
      %54 = vector.load %arg9[%c0_26, %c0_27] : memref<128x1xf32, #tpu.memory_space<vmem>>, vector<128x1xf32>
      %cst_28 = arith.constant dense<0xFF800000> : vector<128xf32>
      %55 = vector.multi_reduction <maximumf>, %51, %cst_28 [1] : vector<128x128xf32> to vector<128xf32>
      %56 = vector.shape_cast %55 : vector<128xf32> to vector<128x1xf32>
      %57 = arith.maximumf %54, %56 : vector<128x1xf32>
      %58 = arith.subf %54, %57 : vector<128x1xf32>
      %59 = math.exp %58 : vector<128x1xf32>
      %c0_29 = arith.constant 0 : index
      %c0_30 = arith.constant 0 : index
      %60 = vector.load %arg10[%c0_29, %c0_30] : memref<128x1xf32, #tpu.memory_space<vmem>>, vector<128x1xf32>
      %61 = arith.mulf %59, %60 : vector<128x1xf32>
      %62 = vector.broadcast %57 : vector<128x1xf32> to vector<128x128xf32>
      %63 = arith.subf %51, %62 : vector<128x128xf32>
      %64 = math.exp %63 : vector<128x128xf32>
      %cst_31 = arith.constant dense<0.000000e+00> : vector<128xf32>
      %65 = vector.multi_reduction <add>, %64, %cst_31 [1] : vector<128x128xf32> to vector<128xf32>
      %66 = vector.shape_cast %65 : vector<128xf32> to vector<128x1xf32>
      %67 = arith.addf %61, %66 : vector<128x1xf32>
      %c0_32 = arith.constant 0 : index
      %c0_33 = arith.constant 0 : index
      %68 = vector.load %arg10[%c0_32, %c0_33] : memref<128x1xf32, #tpu.memory_space<vmem>>, vector<128x1xf32>
      tpu.vector_store %arg10[%c0_32, %c0_33], %67 {strides = array<i32>} : memref<128x1xf32, #tpu.memory_space<vmem>>, vector<128x1xf32>,
      %c0_34 = arith.constant 0 : index
      %c0_35 = arith.constant 0 : index
      %69 = vector.load %arg9[%c0_34, %c0_35] : memref<128x1xf32, #tpu.memory_space<vmem>>, vector<128x1xf32>
      tpu.vector_store %arg9[%c0_34, %c0_35], %57 {strides = array<i32>} : memref<128x1xf32, #tpu.memory_space<vmem>>, vector<128x1xf32>,
      %c0_36 = arith.constant 0 : index
      %c0_37 = arith.constant 0 : index
      %70 = vector.load %arg11[%c0_36, %c0_37] : memref<128x1xf32, #tpu.memory_space<vmem>>, vector<128x1xf32>
      %cst_38 = arith.constant dense<0.000000e+00> : vector<128xf32>
      %71 = vector.multi_reduction <add>, %53, %cst_38 [1] : vector<128x128xf32> to vector<128xf32>
      %72 = vector.shape_cast %71 : vector<128xf32> to vector<128x1xf32>
      %73 = arith.addf %70, %72 : vector<128x1xf32>
      %c0_39 = arith.constant 0 : index
      %c0_40 = arith.constant 0 : index
      %74 = vector.load %arg11[%c0_39, %c0_40] : memref<128x1xf32, #tpu.memory_space<vmem>>, vector<128x1xf32>
      tpu.vector_store %arg11[%c0_39, %c0_40], %73 {strides = array<i32>} : memref<128x1xf32, #tpu.memory_space<vmem>>, vector<128x1xf32>,
      %c0_41 = arith.constant 0 : index
      %c0_42 = arith.constant 0 : index
      %75 = vector.load %arg12[%c0_41, %c0_42] : memref<128x1xf32, #tpu.memory_space<vmem>>, vector<128x1xf32>
      %76 = arith.mulf %53, %7 : vector<128x128xf32>
      %cst_43 = arith.constant dense<0.000000e+00> : vector<128xf32>
      %77 = vector.multi_reduction <add>, %76, %cst_43 [1] : vector<128x128xf32> to vector<128xf32>
      %78 = vector.shape_cast %77 : vector<128xf32> to vector<128x1xf32>
      %79 = arith.addf %75, %78 : vector<128x1xf32>
      %c0_44 = arith.constant 0 : index
      %c0_45 = arith.constant 0 : index
      %80 = vector.load %arg12[%c0_44, %c0_45] : memref<128x1xf32, #tpu.memory_space<vmem>>, vector<128x1xf32>
      tpu.vector_store %arg12[%c0_44, %c0_45], %79 {strides = array<i32>} : memref<128x1xf32, #tpu.memory_space<vmem>>, vector<128x1xf32>,
    } else {
    }
    %true = arith.constant true
    %28 = arith.xori %25, %true : i1
    %29 = arith.extui %28 : i1 to i32
    %c0_i32_19 = arith.constant 0 : i32
    %30 = arith.cmpi ne, %29, %c0_i32_19 : i32
    scf.if %30 {
      %34 = vector.broadcast %18 : vector<1x128xf32> to vector<128x128xf32>
      %35 = arith.addf %7, %34 : vector<128x128xf32>
      %cst_22 = arith.constant 0.000000e+00 : f32
      %36 = vector.shape_cast %14 : vector<1x128xf32> to vector<1x128xf32>
      %37 = vector.broadcast %36 : vector<1x128xf32> to vector<128x128xf32>
      %38 = vector.broadcast %cst_22 : f32 to vector<128x128xf32>
      %39 = arith.select %12, %37, %38 : vector<128x128xi1>, vector<128x128xf32>
      %40 = vector.broadcast %13 : vector<128x1xf32> to vector<128x128xf32>
      %41 = arith.mulf %39, %40 : vector<128x128xf32>
      %c0_23 = arith.constant 0 : index
      %c0_24 = arith.constant 0 : index
      %42 = vector.load %arg9[%c0_23, %c0_24] : memref<128x1xf32, #tpu.memory_space<vmem>>, vector<128x1xf32>
      %cst_25 = arith.constant dense<0xFF800000> : vector<128xf32>
      %43 = vector.multi_reduction <maximumf>, %35, %cst_25 [1] : vector<128x128xf32> to vector<128xf32>
      %44 = vector.shape_cast %43 : vector<128xf32> to vector<128x1xf32>
      %45 = arith.maximumf %42, %44 : vector<128x1xf32>
      %46 = arith.subf %42, %45 : vector<128x1xf32>
      %47 = math.exp %46 : vector<128x1xf32>
      %c0_26 = arith.constant 0 : index
      %c0_27 = arith.constant 0 : index
      %48 = vector.load %arg10[%c0_26, %c0_27] : memref<128x1xf32, #tpu.memory_space<vmem>>, vector<128x1xf32>
      %49 = arith.mulf %47, %48 : vector<128x1xf32>
      %50 = vector.broadcast %45 : vector<128x1xf32> to vector<128x128xf32>
      %51 = arith.subf %35, %50 : vector<128x128xf32>
      %52 = math.exp %51 : vector<128x128xf32>
      %cst_28 = arith.constant dense<0.000000e+00> : vector<128xf32>
      %53 = vector.multi_reduction <add>, %52, %cst_28 [1] : vector<128x128xf32> to vector<128xf32>
      %54 = vector.shape_cast %53 : vector<128xf32> to vector<128x1xf32>
      %55 = arith.addf %49, %54 : vector<128x1xf32>
      %c0_29 = arith.constant 0 : index
      %c0_30 = arith.constant 0 : index
      %56 = vector.load %arg10[%c0_29, %c0_30] : memref<128x1xf32, #tpu.memory_space<vmem>>, vector<128x1xf32>
      tpu.vector_store %arg10[%c0_29, %c0_30], %55 {strides = array<i32>} : memref<128x1xf32, #tpu.memory_space<vmem>>, vector<128x1xf32>,
      %c0_31 = arith.constant 0 : index
      %c0_32 = arith.constant 0 : index
      %57 = vector.load %arg9[%c0_31, %c0_32] : memref<128x1xf32, #tpu.memory_space<vmem>>, vector<128x1xf32>
      tpu.vector_store %arg9[%c0_31, %c0_32], %45 {strides = array<i32>} : memref<128x1xf32, #tpu.memory_space<vmem>>, vector<128x1xf32>,
      %c0_33 = arith.constant 0 : index
      %c0_34 = arith.constant 0 : index
      %58 = vector.load %arg11[%c0_33, %c0_34] : memref<128x1xf32, #tpu.memory_space<vmem>>, vector<128x1xf32>
      %cst_35 = arith.constant dense<0.000000e+00> : vector<128xf32>
      %59 = vector.multi_reduction <add>, %41, %cst_35 [1] : vector<128x128xf32> to vector<128xf32>
      %60 = vector.shape_cast %59 : vector<128xf32> to vector<128x1xf32>
      %61 = arith.addf %58, %60 : vector<128x1xf32>
      %c0_36 = arith.constant 0 : index
      %c0_37 = arith.constant 0 : index
      %62 = vector.load %arg11[%c0_36, %c0_37] : memref<128x1xf32, #tpu.memory_space<vmem>>, vector<128x1xf32>
      tpu.vector_store %arg11[%c0_36, %c0_37], %61 {strides = array<i32>} : memref<128x1xf32, #tpu.memory_space<vmem>>, vector<128x1xf32>,
      %c0_38 = arith.constant 0 : index
      %c0_39 = arith.constant 0 : index
      %63 = vector.load %arg12[%c0_38, %c0_39] : memref<128x1xf32, #tpu.memory_space<vmem>>, vector<128x1xf32>
      %64 = arith.mulf %41, %7 : vector<128x128xf32>
      %cst_40 = arith.constant dense<0.000000e+00> : vector<128xf32>
      %65 = vector.multi_reduction <add>, %64, %cst_40 [1] : vector<128x128xf32> to vector<128xf32>
      %66 = vector.shape_cast %65 : vector<128xf32> to vector<128x1xf32>
      %67 = arith.addf %63, %66 : vector<128x1xf32>
      %c0_41 = arith.constant 0 : index
      %c0_42 = arith.constant 0 : index
      %68 = vector.load %arg12[%c0_41, %c0_42] : memref<128x1xf32, #tpu.memory_space<vmem>>, vector<128x1xf32>
      tpu.vector_store %arg12[%c0_41, %c0_42], %67 {strides = array<i32>} : memref<128x1xf32, #tpu.memory_space<vmem>>, vector<128x1xf32>,
    } else {
    }
    %c0_i32_20 = arith.constant 0 : i32
    %31 = arith.cmpi eq, %arg1, %c0_i32_20 : i32
    %32 = arith.extui %31 : i1 to i32
    %c0_i32_21 = arith.constant 0 : i32
    %33 = arith.cmpi ne, %32, %c0_i32_21 : i32
    scf.if %33 {
      %c0_22 = arith.constant 0 : index
      %c0_23 = arith.constant 0 : index
      %34 = vector.load %arg9[%c0_22, %c0_23] : memref<128x1xf32, #tpu.memory_space<vmem>>, vector<128x1xf32>
      %c0_24 = arith.constant 0 : index
      %c0_25 = arith.constant 0 : index
      %35 = vector.load %arg10[%c0_24, %c0_25] : memref<128x1xf32, #tpu.memory_space<vmem>>, vector<128x1xf32>
      %36 = math.log %35 : vector<128x1xf32>
      %37 = arith.addf %34, %36 : vector<128x1xf32>
      %c0_26 = arith.constant 0 : index
      %c0_27 = arith.constant 0 : index
      %38 = vector.load %arg11[%c0_26, %c0_27] : memref<128x1xf32, #tpu.memory_space<vmem>>, vector<128x1xf32>
      %cst_28 = arith.constant 9.99999997E-7 : f32
      %39 = vector.broadcast %cst_28 : f32 to vector<128x1xf32>
      %40 = arith.cmpf olt, %38, %39 : vector<128x1xf32>
      %cst_29 = arith.constant 1.000000e+00 : f32
      %41 = vector.broadcast %cst_29 : f32 to vector<128x1xf32>
      %42 = arith.select %40, %41, %38 : vector<128x1xi1>, vector<128x1xf32>
      %c0_30 = arith.constant 0 : index
      %c0_31 = arith.constant 0 : index
      %43 = vector.load %arg12[%c0_30, %c0_31] : memref<128x1xf32, #tpu.memory_space<vmem>>, vector<128x1xf32>
      %44 = arith.mulf %38, %37 : vector<128x1xf32>
      %45 = arith.subf %43, %44 : vector<128x1xf32>
      %46 = tpu.reciprocal %42 {approx = true} : vector<128x1xf32> -> vector<128x1xf32>
      %47 = arith.mulf %45, %46 : vector<128x1xf32>
      %cst_32 = arith.constant -1.000000e+00 : f32
      %48 = vector.broadcast %cst_32 : f32 to vector<128x1xf32>
      %49 = arith.mulf %48, %47 : vector<128x1xf32>
      %c0_33 = arith.constant 0 : index
      %c0_34 = arith.constant 0 : index
      %50 = vector.load %arg8[%c0_33, %c0_34] : memref<128x1xf32, #tpu.memory_space<vmem>>, vector<128x1xf32>
      tpu.vector_store %arg8[%c0_33, %c0_34], %49 {strides = array<i32>} : memref<128x1xf32, #tpu.memory_space<vmem>>, vector<128x1xf32>,
    } else {
    }
    return
  }
  func.func @transform_0(%arg0: i32, %arg1: i32) -> (i32, i32) {
    %c0_i32 = arith.constant 0 : i32
    %c0_i32_0 = arith.constant 0 : i32
    return %arg0, %c0_i32 : i32, i32
  }
  func.func @transform_1(%arg0: i32, %arg1: i32) -> (i32, i32) {
    %c0_i32 = arith.constant 0 : i32
    %c0_i32_0 = arith.constant 0 : i32
    return %arg1, %c0_i32 : i32, i32
  }
  func.func @transform_2(%arg0: i32, %arg1: i32) -> (i32, i32) {
    %c0_i32 = arith.constant 0 : i32
    %c0_i32_0 = arith.constant 0 : i32
    return %arg0, %c0_i32 : i32, i32
  }
  func.func @transform_3(%arg0: i32, %arg1: i32) -> (i32, i32) {
    %c0_i32 = arith.constant 0 : i32
    %c0_i32_0 = arith.constant 0 : i32
    return %c0_i32, %arg1 : i32, i32
  }
  func.func @transform_4(%arg0: i32, %arg1: i32) -> (i32, i32) {
    %c0_i32 = arith.constant 0 : i32
    %c0_i32_0 = arith.constant 0 : i32
    return %arg0, %c0_i32 : i32, i32
  }
  func.func @transform_5(%arg0: i32, %arg1: i32) -> (i32, i32) {
    %c0_i32 = arith.constant 0 : i32
    %c0_i32_0 = arith.constant 0 : i32
    return %c0_i32, %arg1 : i32, i32
  }
  func.func @transform_6(%arg0: i32, %arg1: i32) -> (i32, i32) {
    %c0_i32 = arith.constant 0 : i32
    %c0_i32_0 = arith.constant 0 : i32
    return %arg0, %c0_i32 : i32, i32
  }
}

</mosaic_0001>

<bundles_post_ra>
// kernel: tpu_custom_call.1
= control target key start
LH: loop header
LB: loop body
LE: loop exit
PB: predicated region body
PF: predicated region fallthrough
CT: control target
= control target key end

     0   :  { %vm205_vm0 = vcmask 261120   ;;  %v2410_v1 = vmov 0   ;;  %v481_v48 = vlaneseq  ;;  %s3730_s1 = inlined_call_operand.vmem [shape: bf16[128,32], index: 1, kind: input, shape index: {}]   ;;  %s3731_s0 = inlined_call_operand.vmem [shape: bf16[128,32], index: 0, kind: input, shape index: {}]   ;;  %s3732_s2 = inlined_call_operand.vmem [shape: s32[128,1], index: 2, kind: input, shape index: {}]   ;;  %s3733_s4 = inlined_call_operand.vmem [shape: f32[128,1], index: 4, kind: input, shape index: {}]   ;;  %s3734_s5 = inlined_call_operand.vmem [shape: f32[1,128], index: 5, kind: input, shape index: {}]   ;;  %s3735_s3 = inlined_call_operand.vmem [shape: s32[1,128], index: 3, kind: input, shape index: {}]   ;;  %s3736_s6 = inlined_call_operand.vmem [shape: f32[128,1], index: 6, kind: output, shape index: {}]  }
   0x1   :  { %v2266_v0 = vld [vmem:[%s3730_s1] sm:$0xff]   ;;  %2265 = vset.pattern.permute.xlu1 %v2410_v1  ;;  %2264 = vset.pattern.permute.xlu0 %v2410_v1  ;;  %v2267_v2 = vld [vmem:[%s3730_s1 + $0x8] sm:$0xff]   ;;  %v2268_v4 = vld [vmem:[%s3730_s1 + $0x10] sm:$0xff]  }
   0x2   :  { %2245 = vmatprep.subr.msk.bf16.mxu0 %vm205_vm0, %v2266_v0  ;;  %2246 = vmatprep.subr.msk.bf16.mxu1 %vm205_vm0, %v2266_v0  ;;  %v231_v3 = vsel %vm205_vm0, %v2266_v0, 0  ;;  %v234_v5 = vsel %vm205_vm0, %v2267_v2, 0  ;;  %v2274_v6 = vld [vmem:[%s3731_s0] sm:$0xff]   ;;  %v369_v8 = vld [vmem:[%s3732_s2 + $0x10] sm:$0xff]  ;;  %v370_v9 = vld [vmem:[%s3732_s2 + $0x18] sm:$0xff]  ;;  %v237_v11 = vsel %vm205_vm0, %v2268_v4, 0 }
   0x3   :  { %2198 = vmatpush3.bf16.xpose.msra.mxu0 %v231_v3  ;;  %2237 = vmatpush3.bf16.xpose.msra.mxu1 %v231_v3  ;;  %v2275_v7 = vld [vmem:[%s3731_s0 + $0x20] sm:$0xff]   ;;  %v2269_v12 = vld [vmem:[%s3730_s1 + $0x18] sm:$0xff]   ;;  %v372_v13 = vld [vmem:[%s3732_s2 + $0x28] sm:$0xff]  ;;  %v2597_v49 = vshrl.u32 %v481_v48, 7  ;;  %v2604_v52 = vand.u32 127, %v481_v48 }
   0x4   :  { %2247 = vmatprep.subr.msk.bf16.mxu0 %vm205_vm0, %v2267_v2  ;;  %2248 = vmatprep.subr.msk.bf16.mxu1 %vm205_vm0, %v2267_v2  ;;  %v367_v10 = vld [vmem:[%s3732_s2] sm:$0xff]  ;;  %v368_v14 = vld [vmem:[%s3732_s2 + $0x8] sm:$0xff]  ;;  %v374_v15 = vld [vmem:[%s3732_s2 + $0x38] sm:$0xff]  ;;  %v240_v17 = vsel %vm205_vm0, %v2269_v12, 0  ;;  %v2412_v2 = vmov -1e+30  }
   0x5   :  { %2213 = vmatprep.mubr.msk.bf16.mxu0 %vm205_vm0, %v2274_v6  ;;  %2221 = vmatprep.mubr.msk.bf16.mxu1 %vm205_vm0, %v2275_v7  ;;  %v371_v16 = vld [vmem:[%s3732_s2 + $0x20] sm:$0xff]  ;;  %v376_v19 = vld [vmem:[%s3732_s2 + $0x48] sm:$0xff]  ;;  %v373_v20 = vld [vmem:[%s3732_s2 + $0x30] sm:$0xff]  ;;  %v2600_v50 = vadd.s32 24, %v2597_v49  ;;  %v554_v53 = vsub.s32 0, %v2597_v49  ;;  %v2622_v58 = vadd.s32 40, %v2597_v49 }
   0x6   :  { %391 = vperm.xlu1 %2265, %v369_v8   ;;  %385 = vperm.xlu0 %2264, %v367_v10   ;;  %v2270_v18 = vld [vmem:[%s3730_s1 + $0x20] sm:$0xff]   ;;  %v378_v21 = vld [vmem:[%s3732_s2 + $0x58] sm:$0xff]  ;;  %v2271_v24 = vld [vmem:[%s3730_s1 + $0x28] sm:$0xff]   ;;  %v2641_v62 = vadd.s32 56, %v2597_v49  ;;  %v2646_v1 = vadd.s32 32, %v2597_v49  ;;  %v2659_v3 = vadd.s32 72, %v2597_v49 }
   0x7   :  { %v375_v22 = vld [vmem:[%s3732_s2 + $0x40] sm:$0xff]  ;;  %v243_v23 = vsel %vm205_vm0, %v2270_v18, 0  ;;  %v380_v25 = vld [vmem:[%s3732_s2 + $0x68] sm:$0xff]  ;;  %v377_v26 = vld [vmem:[%s3732_s2 + $0x50] sm:$0xff]  ;;  %v246_v29 = vsel %vm205_vm0, %v2271_v24, 0  ;;  %vm3743_vm1 = vcmp.ne.s32.totalorder %v2600_v50, %v2604_v52  ;;  %vm3737_vm4 = vcmp.ne.s32.totalorder %v2622_v58, %v2604_v52 }
   0x8   :  { %v382_v27 = vld [vmem:[%s3732_s2 + $0x78] sm:$0xff]  ;;  %v379_v28 = vld [vmem:[%s3732_s2 + $0x60] sm:$0xff]  ;;  %v2272_v30 = vld [vmem:[%s3730_s1 + $0x30] sm:$0xff]   ;;  %vm3739_vm7 = vcmp.ne.s32.totalorder %v2641_v62, %v2604_v52  ;;  %v2665_v7 = vadd.s32 48, %v2597_v49  ;;  %vm3738_vm8 = vcmp.ne.s32.totalorder %v2646_v1, %v2604_v52  ;;  %vm3741_vm12 = vcmp.ne.s32.totalorder %v2659_v3, %v2604_v52 }
   0x9   :  { %v453_v31 = vld [vmem:[%s3733_s4 + $0x8] sm:$0xff]  ;;  %v381_v32 = vld [vmem:[%s3732_s2 + $0x70] sm:$0xff]  ;;  %v455_v33 = vld [vmem:[%s3733_s4 + $0x18] sm:$0xff]  ;;  %v249_v35 = vsel %vm205_vm0, %v2272_v30, 0  ;;  %v2684_v10 = vadd.s32 64, %v2597_v49 }
   0xa   :  { %394 = vperm.xlu1 %2265, %v370_v9   ;;  %388 = vperm.xlu0 %2264, %v368_v14   ;;  %v452_v34 = vld [vmem:[%s3733_s4] sm:$0xff]  ;;  %v2273_v36 = vld [vmem:[%s3730_s1 + $0x38] sm:$0xff]   ;;  %v457_v37 = vld [vmem:[%s3733_s4 + $0x28] sm:$0xff]  ;;  %v2694_v14 = vadd.s32 88, %v2597_v49  ;;  %vm3740_vm14 = vcmp.ne.s32.totalorder %v2665_v7, %v2604_v52 }
   0xb   :  { %2200 = vmatpush3.bf16.xpose.msra.mxu0 %v234_v5  ;;  %2238 = vmatpush3.bf16.xpose.msra.mxu1 %v234_v5  ;;  %v454_v38 = vld [vmem:[%s3733_s4 + $0x10] sm:$0xff]  ;;  %v459_v39 = vld [vmem:[%s3733_s4 + $0x38] sm:$0xff]  ;;  %v252_v40 = vsel %vm205_vm0, %v2273_v36, 0  ;;  %v461_v41 = vld [vmem:[%s3733_s4 + $0x48] sm:$0xff] }
   0xc   :  { %2249 = vmatprep.subr.msk.bf16.mxu0 %vm205_vm0, %v2268_v4  ;;  %2250 = vmatprep.subr.msk.bf16.mxu1 %vm205_vm0, %v2268_v4  ;;  %v2276_v42 = vld [vmem:[%s3731_s0 + $0x8] sm:$0xff]   ;;  %v2278_v44 = vld [vmem:[%s3731_s0 + $0x10] sm:$0xff]   ;;  %v2279_v46 = vld [vmem:[%s3731_s0 + $0x18] sm:$0xff]  }
   0xd   :  { %v2277_v43 = vld [vmem:[%s3731_s0 + $0x28] sm:$0xff]   ;;  %v2280_v45 = vld [vmem:[%s3731_s0 + $0x30] sm:$0xff]   ;;  %v2281_v47 = vld [vmem:[%s3731_s0 + $0x38] sm:$0xff]  }
   0xe   :  { %400 = vperm.xlu1 %2265, %v372_v13   ;;  %397 = vperm.xlu0 %2264, %v371_v16   ;;  %v2610_v54 = vld [vmem:[%s3734_s5] sm:$0x1]  ;;  %v2704_v16 = vadd.s32 8, %v2597_v49 }
   0xf   :  { %v2619_v56 = vld [vmem:[%s3735_s3] ss:$0 sm:$0xff]  ;;  %v2628_v59 = vrot.slane %v2610_v54, %v554_v53 }
  0x12   :  { %406 = vperm.xlu1 %2265, %v374_v15   ;;  %403 = vperm.xlu0 %2264, %v373_v20   ;;  %v3790_v20 = vmov 0 }
  0x13   :  { %2202 = vmatpush3.bf16.xpose.msra.mxu0 %v237_v11  ;;  %2239 = vmatpush3.bf16.xpose.msra.mxu1 %v237_v11 }
  0x14   :  { %2251 = vmatprep.subr.msk.bf16.mxu0 %vm205_vm0, %v2269_v12  ;;  %2252 = vmatprep.subr.msk.bf16.mxu1 %vm205_vm0, %v2269_v12 }
  0x16   :  { %412 = vperm.xlu1 %2265, %v376_v19   ;;  %409 = vperm.xlu0 %2264, %v375_v22  }
  0x1a   :  { %418 = vperm.xlu1 %2265, %v378_v21   ;;  %415 = vperm.xlu0 %2264, %v377_v26   ;;  %v2751_v26 = vadd.s32 120, %v2597_v49 }
  0x1b   :  { %2204 = vmatpush3.bf16.xpose.msra.mxu0 %v240_v17  ;;  %2240 = vmatpush3.bf16.xpose.msra.mxu1 %v240_v17 }
  0x1c   :  { %2253 = vmatprep.subr.msk.bf16.mxu0 %vm205_vm0, %v2270_v18  ;;  %2254 = vmatprep.subr.msk.bf16.mxu1 %vm205_vm0, %v2270_v18  ;;  %v2714_v18 = vadd.s32 104, %v2597_v49 }
  0x1e   :  { %424 = vperm.xlu1 %2265, %v380_v25   ;;  %421 = vperm.xlu0 %2264, %v379_v28   ;;  %v3792_v25 = vmov 0 }
  0x22   :  { %430 = vperm.xlu1 %2265, %v382_v27   ;;  %427 = vperm.xlu0 %2264, %v381_v32  }
  0x23   :  { %2206 = vmatpush3.bf16.xpose.msra.mxu0 %v243_v23  ;;  %2241 = vmatpush3.bf16.xpose.msra.mxu1 %v243_v23  ;;  %v2729_v23 = vadd.s32 80, %v2597_v49 }
  0x24   :  { %2255 = vmatprep.subr.msk.bf16.mxu0 %vm205_vm0, %v2271_v24  ;;  %2256 = vmatprep.subr.msk.bf16.mxu1 %vm205_vm0, %v2271_v24 }
  0x26   :  { %618 = vperm.xlu1 %2265, %v453_v31   ;;  %613 = vperm.xlu0 %2264, %v452_v34   ;;  %v2766_v31 = vadd.s32 96, %v2597_v49  ;;  %v3798_v34 = vmov 0 }
  0x2a   :  { %628 = vperm.xlu1 %2265, %v455_v33   ;;  %623 = vperm.xlu0 %2264, %v454_v38  }
  0x2b   :  { %2208 = vmatpush3.bf16.xpose.msra.mxu0 %v246_v29  ;;  %2242 = vmatpush3.bf16.xpose.msra.mxu1 %v246_v29 }
  0x2c   :  { %2257 = vmatprep.subr.msk.bf16.mxu0 %vm205_vm0, %v2272_v30  ;;  %2258 = vmatprep.subr.msk.bf16.mxu1 %vm205_vm0, %v2272_v30 }
  0x2e   :  { %638 = vperm.xlu1 %2265, %v457_v37  }
  0x32   :  { %648 = vperm.xlu1 %2265, %v459_v39  }
  0x33   :  { %2210 = vmatpush3.bf16.xpose.msra.mxu0 %v249_v35  ;;  %2243 = vmatpush3.bf16.xpose.msra.mxu1 %v249_v35  ;;  %v2794_v35 = vadd.s32 112, %v2597_v49 }
  0x34   :  { %2259 = vmatprep.subr.msk.bf16.mxu0 %vm205_vm0, %v2273_v36  ;;  %2260 = vmatprep.subr.msk.bf16.mxu1 %vm205_vm0, %v2273_v36 }
  0x36   :  { %658 = vperm.xlu1 %2265, %v461_v41  }
  0x3b   :  { %2212 = vmatpush3.bf16.xpose.msra.mxu0 %v252_v40  ;;  %2244 = vmatpush3.bf16.xpose.msra.mxu1 %v252_v40  ;;  %v2807_v40 = vadd.s32 16, %v2597_v49 }
  0x42   :  { %2214 = vmatmul.mubr.msk.bf16.vlgmr.msra.gmra.mrb[0].mxu0 %vm205_vm0, %v2276_v42  ;;  %2222 = vmatmul.mubr.msk.bf16.vlgmr.msra.gmra.mrb[0].mxu1 %vm205_vm0, %v2277_v43 }
  0x43   :  { %2217 = vmatprep.mubr.msk.bf16.mxu0 %vm205_vm0, %v2278_v44  ;;  %2225 = vmatprep.mubr.msk.bf16.mxu1 %vm205_vm0, %v2280_v45 }
  0x4a   :  { %2218 = vmatmul.mubr.msk.bf16.gmra.mrb[4].mxu0 %vm205_vm0, %v2279_v46  ;;  %2226 = vmatmul.mubr.msk.bf16.gmra.mrb[4].mxu1 %vm205_vm0, %v2281_v47 }
  0x85   :  { %v2602_v51 = vpop.permute.xlu1 %391  ;;  %v2612_v55 = vpop.permute.xlu0 %385 }
  0x89   :  { %v395_v57 = vpop.permute.xlu1 %394  ;;  %v389_v0 = vpop.permute.xlu0 %388 }
  0x8a   :  { %vm439_vm2 = vcmp.eq.s32.totalorder %v395_v57, %v2619_v56 }
  0x8b   :  { %vm2633_vm3 = vmand %vm439_vm2, %vm3743_vm1 }
  0x8c   :  { %v582_v61 = vsel %vm2633_vm3, %v2628_v59, 0.0  ;;  %vm3814_vm3 = vcmp.ne.s32.totalorder %v2729_v23, %v2604_v52 }
  0x8d   :  { %v401_v63 = vpop.permute.xlu1 %400  ;;  %v398_v5 = vpop.permute.xlu0 %397 }
  0x8e   :  { %vm441_vm5 = vcmp.eq.s32.totalorder %v401_v63, %v2619_v56  ;;  %vm440_vm10 = vcmp.eq.s32.totalorder %v398_v5, %v2619_v56 }
  0x8f   :  { %vm2652_vm6 = vmand %vm441_vm5, %vm3737_vm4  ;;  %vm3742_vm5 = vcmp.ne.s32.totalorder %v2684_v10, %v2604_v52 }
  0x90   :  { %v584_v6 = vsel %vm2652_vm6, %v2628_v59, 0.0  ;;  %vm2689_vm13 = vmand %vm440_vm10, %vm3738_vm8  ;;  %vm3744_vm10 = vcmp.ne.s32.totalorder %v2694_v14, %v2604_v52  ;;  %vm3748_vm8 = vcmp.ne.s32.totalorder %v2704_v16, %v2604_v52  ;;  %vm3813_vm6 = vcmp.ne.s32.totalorder %v2597_v49, %v2604_v52 }
  0x91   :  { %v407_v4 = vpop.permute.xlu1 %406  ;;  %v404_v13 = vpop.permute.xlu0 %403 }
  0x92   :  { %vm443_vm9 = vcmp.eq.s32.totalorder %v407_v4, %v2619_v56  ;;  %vm442_vm0 = vcmp.eq.s32.totalorder %v404_v13, %v2619_v56 }
  0x93   :  { %vm2674_vm11 = vmand %vm443_vm9, %vm3739_vm7 }
  0x94   :  { %v586_v9 = vsel %vm2674_vm11, %v2628_v59, 0.0  ;;  %vm2724_vm9 = vmand %vm442_vm0, %vm3740_vm14  ;;  %vm437_vm0 = vcmp.eq.s32.totalorder %v389_v0, %v2619_v56  ;;  %vm3747_vm14 = vcmp.ne.s32.totalorder %v2714_v18, %v2604_v52  ;;  %vm3815_vm11 = vcmp.ne.s32.totalorder %v2600_v50, %v2604_v52 }
  0x95   :  { %v413_v12 = vpop.permute.xlu1 %412  ;;  %v3791_v20 = vsel %vm2724_vm9, 4294967295, %v3790_v20  ;;  %v410_v22 = vpop.permute.xlu0 %409 }
  0x96   :  { %vm445_vm15 = vcmp.eq.s32.totalorder %v413_v12, %v2619_v56  ;;  %vm444_vm4 = vcmp.eq.s32.totalorder %v410_v22, %v2619_v56 }
  0x97   :  { %vm2709_vm2 = vmand %vm445_vm15, %vm3741_vm12 }
  0x98   :  { %vm2744_vm7 = vmand %vm444_vm4, %vm3742_vm5 }
  0x99   :  { %v419_v21 = vpop.permute.xlu1 %418  ;;  %v3793_v25 = vsel %vm2744_vm7, 4294967295, %v3792_v25  ;;  %v416_v30 = vpop.permute.xlu0 %415  ;;  %vm3750_vm7 = vcmp.ne.s32.totalorder %v2597_v49, %v2604_v52 }
  0x9a   :  { %vm447_vm15 = vcmp.eq.s32.totalorder %v419_v21, %v2619_v56  ;;  %vm446_vm1 = vcmp.eq.s32.totalorder %v416_v30, %v2619_v56 }
  0x9b   :  { %vm2759_vm12 = vmand %vm447_vm15, %vm3744_vm10  ;;  %vm436_vm10 = vcmp.eq.s32.totalorder %v2612_v55, %v2619_v56 }
  0x9c   :  { %vm2776_vm15 = vmand %vm437_vm0, %vm3748_vm8  ;;  %vm3800_vm0 = vcmp.ne.s32.totalorder %v2729_v23, %v2604_v52 }
  0x9d   :  { %v425_v29 = vpop.permute.xlu1 %424  ;;  %v422_v39 = vpop.permute.xlu0 %421  ;;  %v580_v44 = vsel %vm2776_vm15, %v2628_v59, 0.0  ;;  %vm521_vm15 = vcmp.ne.s32.totalorder %v2807_v40, %v2604_v52 }
  0x9e   :  { %vm449_vm5 = vcmp.eq.s32.totalorder %v425_v29, %v2619_v56  ;;  %vm448_vm9 = vcmp.eq.s32.totalorder %v422_v39, %v2619_v56 }
  0x9f   :  { %vm2785_vm4 = vmand %vm449_vm5, %vm3747_vm14  ;;  %vm533_vm14 = vcmp.ne.s32.totalorder %v2794_v35, %v2604_v52 }
  0xa0   :  { %v3799_v34 = vsel %vm2785_vm4, 4294967295, %v3798_v34  ;;  %vm2802_vm5 = vmand %vm446_vm1, %vm3800_vm0  ;;  %vm3805_vm0 = vcmp.ne.s32.totalorder %v2751_v26, %v2604_v52 }
  0xa1   :  { %v431_v38 = vpop.permute.xlu1 %430  ;;  %vm2819_vm1 = vmand %vm436_vm10, %vm3750_vm7  ;;  %vm3808_vm10 = vcmp.ne.s32.totalorder %v2766_v31, %v2604_v52  ;;  %v428_v48 = vpop.permute.xlu0 %427 }
  0xa2   :  { %vm451_vm8 = vcmp.eq.s32.totalorder %v431_v38, %v2619_v56  ;;  %vm2838_vm7 = vmand %vm448_vm9, %vm3808_vm10  ;;  %vm450_vm9 = vcmp.eq.s32.totalorder %v428_v48, %v2619_v56  ;;  %v579_v63 = vsel %vm2819_vm1, %v2628_v59, 0.0  ;;  %vm28_vm1 = vcmask 7168  }
  0xa3   :  { %vm2826_vm4 = vmand %vm451_vm8, %vm3805_vm0  ;;  %vm438_vm8 = vcmp.eq.s32.totalorder %v2602_v51, %v2619_v56  ;;  %v2411_v38 = vmov 0.0   ;;  %31 = vst.msk [vmem:[#allocation2 + $0x10] sm:$0xff] %vm28_vm1, %v2412_v2  ;;  %v3867_v43 = vsel %vm2838_vm7, %v2628_v59, 0.0 }
  0xa4   :  { %vm2861_vm0 = vmand %vm450_vm9, %vm533_vm14  ;;  %61 = vst.msk [vmem:[#allocation4] sm:$0xff] %vm28_vm1, %v2411_v38  ;;  %vm3818_vm9 = vcmp.ne.s32.totalorder %v2704_v16, %v2604_v52 }
  0xa5   :  { %v619_v47 = vpop.permute.xlu1 %618  ;;  %vm537_vm10 = vmand %vm438_vm8, %vm521_vm15  ;;  %v614_v4 = vpop.permute.xlu0 %613  ;;  %45 = vst.msk [vmem:[#allocation3] sm:$0xff] %vm28_vm1, %v2411_v38  ;;  %vm3816_vm8 = vcmp.ne.s32.totalorder %v2684_v10, %v2604_v52  ;;  %v3868_v37 = vsel %vm2861_vm0, %v2628_v59, 0.0 }
  0xa6   :  { %v2852_v57 = vmul.f32 %v619_v47, %v580_v44  ;;  %v2874_v5 = vmul.f32 %v614_v4, %v579_v63  ;;  %v581_v12 = vsel %vm537_vm10, %v2628_v59, 0.0  ;;  %46 = vst.msk [vmem:[#allocation3 + $0x8] sm:$0xff] %vm28_vm1, %v2411_v38  ;;  %47 = vst.msk [vmem:[#allocation3 + $0x10] sm:$0xff] %vm28_vm1, %v2411_v38  ;;  %vm3819_vm10 = vcmp.ne.s32.totalorder %v2659_v3, %v2604_v52 }
  0xa7   :  { %48 = vst.msk [vmem:[#allocation3 + $0x18] sm:$0xff] %vm28_vm1, %v2411_v38  ;;  %49 = vst.msk [vmem:[#allocation3 + $0x20] sm:$0xff] %vm28_vm1, %v2411_v38 }
  0xa8   :  { %1078 = vadd.xlane.f32.xlu0 %v2852_v57  ;;  %1076 = vadd.xlane.f32.xlu1 %v2874_v5  ;;  %50 = vst.msk [vmem:[#allocation3 + $0x28] sm:$0xff] %vm28_vm1, %v2411_v38  ;;  %51 = vst.msk [vmem:[#allocation3 + $0x30] sm:$0xff] %vm28_vm1, %v2411_v38 }
  0xa9   :  { %v2872_v0 = vpop.permute.xlu1 %628  ;;  %v624_v21 = vpop.permute.xlu0 %623  ;;  %52 = vst.msk [vmem:[#allocation3 + $0x38] sm:$0xff] %vm28_vm1, %v2411_v38  ;;  %53 = vst.msk [vmem:[#allocation3 + $0x40] sm:$0xff] %vm28_vm1, %v2411_v38 }
  0xaa   :  { %v2884_v29 = vmul.f32 %v624_v21, %v581_v12  ;;  %54 = vst.msk [vmem:[#allocation3 + $0x48] sm:$0xff] %vm28_vm1, %v2411_v38  ;;  %55 = vst.msk [vmem:[#allocation3 + $0x50] sm:$0xff] %vm28_vm1, %v2411_v38 }
  0xab   :  { %56 = vst.msk [vmem:[#allocation3 + $0x58] sm:$0xff] %vm28_vm1, %v2411_v38  ;;  %57 = vst.msk [vmem:[#allocation3 + $0x60] sm:$0xff] %vm28_vm1, %v2411_v38 }
  0xac   :  { %1080 = vadd.xlane.f32.xlu1 %v2884_v29  ;;  %58 = vst.msk [vmem:[#allocation3 + $0x68] sm:$0xff] %vm28_vm1, %v2411_v38  ;;  %59 = vst.msk [vmem:[#allocation3 + $0x70] sm:$0xff] %vm28_vm1, %v2411_v38 }
  0xad   :  { %v639_v13 = vpop.permute.xlu1 %638  ;;  %60 = vst.msk [vmem:[#allocation3 + $0x78] sm:$0xff] %vm28_vm1, %v2411_v38  ;;  %62 = vst.msk [vmem:[#allocation4 + $0x8] sm:$0xff] %vm28_vm1, %v2411_v38 }
  0xae   :  { %v2882_v22 = vmul.f32 %v639_v13, %v584_v6  ;;  %63 = vst.msk [vmem:[#allocation4 + $0x10] sm:$0xff] %vm28_vm1, %v2411_v38  ;;  %64 = vst.msk [vmem:[#allocation4 + $0x18] sm:$0xff] %vm28_vm1, %v2411_v38  ;;  %v469_v6 = vsub.f32 1.0, %v2610_v54 }
  0xaf   :  { %65 = vst.msk [vmem:[#allocation4 + $0x20] sm:$0xff] %vm28_vm1, %v2411_v38  ;;  %66 = vst.msk [vmem:[#allocation4 + $0x28] sm:$0xff] %vm28_vm1, %v2411_v38 }
  0xb0   :  { %67 = vst.msk [vmem:[#allocation4 + $0x30] sm:$0xff] %vm28_vm1, %v2411_v38  ;;  %68 = vst.msk [vmem:[#allocation4 + $0x38] sm:$0xff] %vm28_vm1, %v2411_v38  ;;  %v470_v8 = vmul.f32 -1e+09, %v469_v6 }
  0xb1   :  { %v649_v30 = vpop.permute.xlu1 %648  ;;  %69 = vst.msk [vmem:[#allocation4 + $0x40] sm:$0xff] %vm28_vm1, %v2411_v38  ;;  %70 = vst.msk [vmem:[#allocation4 + $0x48] sm:$0xff] %vm28_vm1, %v2411_v38 }
  0xb2   :  { %v2891_v33 = vmul.f32 %v649_v30, %v586_v9  ;;  %71 = vst.msk [vmem:[#allocation4 + $0x50] sm:$0xff] %vm28_vm1, %v2411_v38  ;;  %72 = vst.msk [vmem:[#allocation4 + $0x58] sm:$0xff] %vm28_vm1, %v2411_v38  ;;  %v2960_v9 = vrot.slane %v470_v8, %v554_v53 }
  0xb3   :  { %73 = vst.msk [vmem:[#allocation4 + $0x60] sm:$0xff] %vm28_vm1, %v2411_v38  ;;  %74 = vst.msk [vmem:[#allocation4 + $0x68] sm:$0xff] %vm28_vm1, %v2411_v38 }
  0xb4   :  { %75 = vst.msk [vmem:[#allocation4 + $0x70] sm:$0xff] %vm28_vm1, %v2411_v38  ;;  %76 = vst.msk [vmem:[#allocation4 + $0x78] sm:$0xff] %vm28_vm1, %v2411_v38 }
  0xb5   :  { %77 = vst.msk [vmem:[#allocation5] sm:$0xff] %vm28_vm1, %v2411_v38  ;;  %78 = vst.msk [vmem:[#allocation5 + $0x8] sm:$0xff] %vm28_vm1, %v2411_v38 }
  0xb6   :  { %79 = vst.msk [vmem:[#allocation5 + $0x10] sm:$0xff] %vm28_vm1, %v2411_v38  ;;  %80 = vst.msk [vmem:[#allocation5 + $0x18] sm:$0xff] %vm28_vm1, %v2411_v38 }
  0xb7   :  { %81 = vst.msk [vmem:[#allocation5 + $0x20] sm:$0xff] %vm28_vm1, %v2411_v38  ;;  %82 = vst.msk [vmem:[#allocation5 + $0x28] sm:$0xff] %vm28_vm1, %v2411_v38 }
  0xb8   :  { %83 = vst.msk [vmem:[#allocation5 + $0x30] sm:$0xff] %vm28_vm1, %v2411_v38  ;;  %84 = vst.msk [vmem:[#allocation5 + $0x38] sm:$0xff] %vm28_vm1, %v2411_v38 }
  0xb9   :  { %85 = vst.msk [vmem:[#allocation5 + $0x40] sm:$0xff] %vm28_vm1, %v2411_v38  ;;  %86 = vst.msk [vmem:[#allocation5 + $0x48] sm:$0xff] %vm28_vm1, %v2411_v38 }
  0xba   :  { %87 = vst.msk [vmem:[#allocation5 + $0x50] sm:$0xff] %vm28_vm1, %v2411_v38  ;;  %88 = vst.msk [vmem:[#allocation5 + $0x58] sm:$0xff] %vm28_vm1, %v2411_v38 }
  0xbb   :  { %89 = vst.msk [vmem:[#allocation5 + $0x60] sm:$0xff] %vm28_vm1, %v2411_v38  ;;  %90 = vst.msk [vmem:[#allocation5 + $0x68] sm:$0xff] %vm28_vm1, %v2411_v38 }
  0xbc   :  { %91 = vst.msk [vmem:[#allocation5 + $0x70] sm:$0xff] %vm28_vm1, %v2411_v38  ;;  %92 = vst.msk [vmem:[#allocation5 + $0x78] sm:$0xff] %vm28_vm1, %v2411_v38 }
  0xbd   :  { %29 = vst.msk [vmem:[#allocation2] sm:$0xff] %vm28_vm1, %v2412_v2  ;;  %30 = vst.msk [vmem:[#allocation2 + $0x8] sm:$0xff] %vm28_vm1, %v2412_v2 }
  0xbe   :  { %32 = vst.msk [vmem:[#allocation2 + $0x18] sm:$0xff] %vm28_vm1, %v2412_v2  ;;  %33 = vst.msk [vmem:[#allocation2 + $0x20] sm:$0xff] %vm28_vm1, %v2412_v2 }
  0xbf   :  { %34 = vst.msk [vmem:[#allocation2 + $0x28] sm:$0xff] %vm28_vm1, %v2412_v2  ;;  %35 = vst.msk [vmem:[#allocation2 + $0x30] sm:$0xff] %vm28_vm1, %v2412_v2 }
  0xc0   :  { %36 = vst.msk [vmem:[#allocation2 + $0x38] sm:$0xff] %vm28_vm1, %v2412_v2  ;;  %37 = vst.msk [vmem:[#allocation2 + $0x40] sm:$0xff] %vm28_vm1, %v2412_v2 }
  0xc1   :  { %38 = vst.msk [vmem:[#allocation2 + $0x48] sm:$0xff] %vm28_vm1, %v2412_v2  ;;  %39 = vst.msk [vmem:[#allocation2 + $0x50] sm:$0xff] %vm28_vm1, %v2412_v2 }
  0xc2   :  { %40 = vst.msk [vmem:[#allocation2 + $0x58] sm:$0xff] %vm28_vm1, %v2412_v2  ;;  %41 = vst.msk [vmem:[#allocation2 + $0x60] sm:$0xff] %vm28_vm1, %v2412_v2 }
  0xc3   :  { %42 = vst.msk [vmem:[#allocation2 + $0x68] sm:$0xff] %vm28_vm1, %v2412_v2  ;;  %43 = vst.msk [vmem:[#allocation2 + $0x70] sm:$0xff] %vm28_vm1, %v2412_v2 }
  0xc4   :  { %44 = vst.msk [vmem:[#allocation2 + $0x78] sm:$0xff] %vm28_vm1, %v2412_v2 }
 0x115   :  { %v2215_v39 = vpop.f32.mrb[0].mxu0  ;;  %v2223_v42 = vpop.f32.mrb[0].mxu1 }
 0x116   :  { %v2962_v44 = vmul.f32 14.285714, %v2215_v39  ;;  %v2964_v47 = vmul.f32 14.285714, %v2223_v42  ;;  %v288_v48 = vpop.f32.mrb[1].mxu0  ;;  %v320_v63 = vpop.f32.mrb[1].mxu1 }
 0x117   :  { %v2966_v4 = vmul.f32 14.285714, %v288_v48  ;;  %v2216_v12 = vpop.f32.mrb[2].mxu0  ;;  %v2224_v13 = vpop.f32.mrb[2].mxu1  ;;  %v2978_v39 = vmul.f32 14.285714, %v320_v63 }
 0x118   :  { %v354_v21 = vmul.f32 14.285714, %v2216_v12  ;;  %v291_v30 = vpop.f32.mrb[3].mxu0  ;;  %v323_v54 = vpop.f32.mrb[3].mxu1  ;;  %v559_v38 = vadd.f32 %v2960_v9, %v2962_v44  ;;  %v567_v53 = vadd.f32 %v2960_v9, %v2964_v47  ;;  %v2991_v12 = vmul.f32 %v2872_v0, %v582_v61 }
 0x119   :  { %v2972_v2 = vmul.f32 14.285714, %v291_v30  ;;  %v2974_v6 = vmul.f32 14.285714, %v323_v54  ;;  %v557_v8 = vadd.f32 %v2960_v9, %v2966_v4  ;;  %v2993_v30 = vmul.f32 14.285714, %v2224_v13 }
 0x11a   :  { %v2983_v42 = vsel %vm521_vm15, %v559_v38, -1e+09  ;;  %v560_v48 = vadd.f32 %v2960_v9, %v354_v21  ;;  %v3007_v60 = vsel %vm3814_vm3, %v567_v53, -1e+09  ;;  %v3012_v54 = vmul.f32 %v2991_v12, %v354_v21 }
 0x11b   :  { %727 = vmax.xlane.f32.xlu0 %v2983_v42  ;;  %v2999_v63 = vsel %vm3813_vm6, %v557_v8, -1e+09  ;;  %v558_v40 = vadd.f32 %v2960_v9, %v2972_v2  ;;  %v566_v61 = vadd.f32 %v2960_v9, %v2974_v6  ;;  %v565_v38 = vadd.f32 %v2960_v9, %v2978_v39 }
 0x11c   :  { %723 = vmax.xlane.f32.xlu1 %v2999_v63  ;;  %v3020_v23 = vsel %vm3815_vm11, %v560_v48, -1e+09  ;;  %v568_v53 = vadd.f32 %v2960_v9, %v2993_v30  ;;  %vm3817_vm15 = vcmp.ne.s32.totalorder %v2694_v14, %v2604_v52  ;;  %vm3820_vm6 = vcmp.ne.s32.totalorder %v2665_v7, %v2604_v52 }
 0x11d   :  { %v2219_v0 = vpop.f32.mrb[4].mxu0  ;;  %v2227_v13 = vpop.f32.mrb[4].mxu1  ;;  %v3032_v24 = vsel %vm3816_vm8, %v565_v38, -1e+09  ;;  %v3056_v32 = vsel %vm3818_vm9, %v558_v40, -1e+09  ;;  %vm3821_vm3 = vcmp.ne.s32.totalorder %v2641_v62, %v2604_v52  ;;  %vm3822_vm11 = vcmp.ne.s32.totalorder %v2751_v26, %v2604_v52 }
 0x11e   :  { %v304_v49 = vpop.f32.mrb[5].mxu0  ;;  %v336_v8 = vpop.f32.mrb[5].mxu1  ;;  %v3024_v41 = vmul.f32 14.285714, %v2219_v0  ;;  %v3062_v14 = vsel %vm3819_vm10, %v566_v61, -1e+09  ;;  %vm3824_vm8 = vcmp.ne.s32.totalorder %v2622_v58, %v2604_v52  ;;  %vm3826_vm9 = vcmp.ne.s32.totalorder %v2714_v18, %v2604_v52 }
 0x11f   :  { %743 = vmax.xlane.f32.xlu0 %v3007_v60  ;;  %v2220_v56 = vpop.f32.mrb[6].mxu0  ;;  %v2228_v55 = vpop.f32.mrb[6].mxu1  ;;  %v3079_v40 = vmul.f32 14.285714, %v304_v49  ;;  %v3093_v61 = vmul.f32 14.285714, %v336_v8  ;;  %v1156_v45 = vmul.f32 %v2874_v5, %v2966_v4 }
 0x120   :  { %v3026_v21 = vmul.f32 14.285714, %v2220_v56  ;;  %729 = vmax.xlane.f32.xlu1 %v3020_v23  ;;  %v307_v46 = vpop.f32.mrb[7].mxu0  ;;  %v339_v27 = vpop.f32.mrb[7].mxu1  ;;  %v3041_v56 = vsel %vm3817_vm15, %v568_v53, -1e+09  ;;  %v563_v10 = vadd.f32 %v2960_v9, %v3024_v41  ;;  %vm3825_vm15 = vcmp.ne.s32.totalorder %v2766_v31, %v2604_v52 }
 0x121   :  { %v356_v36 = vmul.f32 14.285714, %v307_v46  ;;  %v3044_v46 = vmul.f32 14.285714, %v2227_v13  ;;  %v3051_v38 = vmul.f32 14.285714, %v2228_v55  ;;  %v561_v13 = vadd.f32 %v2960_v9, %v3079_v40  ;;  %v3130_v58 = vpop.permute.xlu1 %658 }
 0x122   :  { %v564_v50 = vadd.f32 %v2960_v9, %v3026_v21  ;;  %v3097_v49 = vmul.f32 14.285714, %v339_v27  ;;  %v569_v26 = vadd.f32 %v2960_v9, %v3093_v61  ;;  %v1061_v53 = vld [vmem:[#allocation4 + $0x8] sm:$0xff] }
 0x123   :  { %v562_v48 = vadd.f32 %v2960_v9, %v356_v36  ;;  %739 = vmax.xlane.f32.xlu0 %v3032_v24  ;;  %v3049_v0 = vmul.f32 %v2882_v22, %v356_v36  ;;  %v3068_v36 = vsel %vm3820_vm6, %v563_v10, -1e+09  ;;  %v571_v55 = vadd.f32 %v2960_v9, %v3044_v46  ;;  %v1060_v10 = vld [vmem:[#allocation4] sm:$0xff] }
 0x124   :  { %745 = vmax.xlane.f32.xlu1 %v3041_v56  ;;  %v3075_v16 = vsel %vm3821_vm3, %v564_v50, -1e+09  ;;  %v572_v3 = vadd.f32 %v2960_v9, %v3051_v38  ;;  %v570_v8 = vadd.f32 %v2960_v9, %v3097_v49 }
 0x125   :  { %v3086_v7 = vsel %vm533_vm14, %v571_v55, -1e+09  ;;  %vm3823_vm14 = vcmp.ne.s32.totalorder %v2646_v1, %v2604_v52  ;;  %v3114_v27 = vsel %vm3824_vm8, %v562_v48, -1e+09  ;;  %v3120_v1 = vsel %vm3825_vm15, %v569_v26, -1e+09 }
 0x126   :  { %v3091_v62 = vsel %vm3822_vm11, %v572_v3, -1e+09  ;;  %v3104_v35 = vsel %vm3823_vm14, %v561_v13, -1e+09  ;;  %v3126_v9 = vsel %vm3826_vm9, %v570_v8, -1e+09 }
 0x127   :  { %725 = vmax.xlane.f32.xlu0 %v3056_v32  ;;  %v1062_v3 = vld [vmem:[#allocation4 + $0x10] sm:$0xff]  ;;  %v464_v13 = vld [vmem:[%s3733_s4 + $0x60] sm:$0xff]  ;;  %v467_v8 = vld [vmem:[%s3733_s4 + $0x78] sm:$0xff] }
 0x128   :  { %741 = vmax.xlane.f32.xlu1 %v3062_v14  ;;  %v456_v26 = vld [vmem:[%s3733_s4 + $0x20] sm:$0xff] }
 0x12b   :  { %735 = vmax.xlane.f32.xlu0 %v3068_v36 }
 0x12c   :  { %737 = vmax.xlane.f32.xlu1 %v3075_v16 }
 0x12f   :  { %751 = vmax.xlane.f32.xlu0 %v3086_v7 }
 0x130   :  { %753 = vmax.xlane.f32.xlu1 %v3091_v62 }
 0x133   :  { %731 = vmax.xlane.f32.xlu0 %v3104_v35 }
 0x134   :  { %733 = vmax.xlane.f32.xlu1 %v3114_v27 }
 0x135   :  { %v1079_v50 = vpop.xlane.xlu0 %1078  ;;  %v1077_v31 = vpop.xlane.xlu1 %1076 }
 0x136   :  { %v1109_v48 = vadd.f32 %v1079_v50, %v1061_v53  ;;  %v1108_v55 = vadd.f32 %v1077_v31, %v1060_v10  ;;  %v458_v53 = vld [vmem:[%s3733_s4 + $0x30] sm:$0xff]  ;;  %v460_v50 = vld [vmem:[%s3733_s4 + $0x40] sm:$0xff]  ;;  %v463_v10 = vld [vmem:[%s3733_s4 + $0x58] sm:$0xff] }
 0x137   :  { %747 = vmax.xlane.f32.xlu0 %v3120_v1  ;;  %v466_v31 = vld [vmem:[%s3733_s4 + $0x70] sm:$0xff] }
 0x138   :  { %749 = vmax.xlane.f32.xlu1 %v3126_v9  ;;  %1125 = vst.msk [vmem:[#allocation4 + $0x8] sm:$0xff] %vm28_vm1, %v1109_v48  ;;  %1124 = vst.msk [vmem:[#allocation4] sm:$0xff] %vm28_vm1, %v1108_v55  ;;  %v462_v48 = vld [vmem:[%s3733_s4 + $0x50] sm:$0xff] }
 0x139   :  { %v1081_v52 = vpop.xlane.xlu1 %1080  ;;  %v3162_v55 = vld [vmem:[#allocation2 + $0x10] sm:$0xff] }
 0x13a   :  { %v1110_v18 = vadd.f32 %v1081_v52, %v1062_v3  ;;  %v3164_v3 = vld [vmem:[#allocation2] sm:$0xff] }
 0x13b   :  { %1082 = vadd.xlane.f32.xlu0 %v2991_v12  ;;  %v465_v12 = vld [vmem:[%s3733_s4 + $0x68] sm:$0xff]  ;;  %3827 = vst [vmem:[#allocation6_spill] sm:$0xff] %v3164_v3 }
 0x13c   :  { %1126 = vst.msk [vmem:[#allocation4 + $0x10] sm:$0xff] %vm28_vm1, %v1110_v18 }
 0x149   :  { %673 = vperm.xlu1 %2265, %v464_v13  }
 0x14d   :  { %678 = vperm.xlu1 %2265, %v465_v12  }
 0x151   :  { %633 = vperm.xlu0 %2264, %v456_v26   ;;  %688 = vperm.xlu1 %2265, %v467_v8   ;;  %v3172_v26 = vld [vmem:[#allocation2 + $0x50] sm:$0xff] }
 0x155   :  { %643 = vperm.xlu0 %2264, %v458_v53   ;;  %v3179_v53 = vld [vmem:[#allocation2 + $0x18] sm:$0xff] }
 0x156   :  { %3829 = vst [vmem:[#allocation8_spill] sm:$0xff] %v3179_v53 }
 0x159   :  { %653 = vperm.xlu0 %2264, %v460_v50   ;;  %v3198_v50 = vld [vmem:[#allocation2 + $0x58] sm:$0xff] }
 0x15a   :  { %3833 = vst [vmem:[#allocation12_spill] sm:$0xff] %v3198_v50 }
 0x15d   :  { %663 = vperm.xlu0 %2264, %v462_v48  }
 0x161   :  { %668 = vperm.xlu0 %2264, %v463_v10  }
 0x165   :  { %683 = vperm.xlu0 %2264, %v466_v31  }
 0x1a8   :  { %v728_v52 = vpop.xlane.xlu0 %727 }
 0x1a9   :  { %v3167_v18 = vmax.f32 %v3162_v55, %v728_v52  ;;  %v724_v13 = vpop.xlane.xlu1 %723 }
 0x1aa   :  { %v3170_v12 = vmax.f32 %v3164_v3, %v724_v13  ;;  %v3191_v13 = vld [vmem:[#allocation2 + $0x40] sm:$0xff]  ;;  %v3211_v3 = vld [vmem:[#allocation2 + $0x8] sm:$0xff] }
 0x1ab   :  { %1046 = vst.msk [vmem:[#allocation2 + $0x10] sm:$0xff] %vm28_vm1, %v3167_v18  ;;  %863 = vperm.xlu0 %2264, %v3167_v18   ;;  %3832 = vst [vmem:[#allocation11_spill] sm:$0xff] %v3191_v13 }
 0x1ac   :  { %3828 = vst [vmem:[#allocation7_spill] sm:$0xff] %v3170_v12  ;;  %1044 = vst.msk [vmem:[#allocation2] sm:$0xff] %vm28_vm1, %v3170_v12  ;;  %v744_v48 = vpop.xlane.xlu0 %743 }
 0x1ad   :  { %v3186_v10 = vmax.f32 %v3172_v26, %v744_v48  ;;  %v730_v31 = vpop.xlane.xlu1 %729  ;;  %3836 = vst [vmem:[#allocation15_spill] sm:$0xff] %v3211_v3  ;;  %v3218_v48 = vld [vmem:[#allocation2 + $0x48] sm:$0xff] }
 0x1ae   :  { %v3189_v52 = vmax.f32 %v3179_v53, %v730_v31  ;;  %3837 = vst [vmem:[#allocation16_spill] sm:$0xff] %v3218_v48  ;;  %v3231_v53 = vld [vmem:[#allocation2 + $0x30] sm:$0xff] }
 0x1af   :  { %3830 = vst [vmem:[#allocation9_spill] sm:$0xff] %v3186_v10  ;;  %1054 = vst.msk [vmem:[#allocation2 + $0x50] sm:$0xff] %vm28_vm1, %v3186_v10  ;;  %903 = vperm.xlu0 %2264, %v3186_v10  }
 0x1b0   :  { %3831 = vst [vmem:[#allocation10_spill] sm:$0xff] %v3189_v52  ;;  %1047 = vst.msk [vmem:[#allocation2 + $0x18] sm:$0xff] %vm28_vm1, %v3189_v52  ;;  %v740_v31 = vpop.xlane.xlu0 %739  ;;  %868 = vperm.xlu1 %2265, %v3189_v52  }
 0x1b1   :  { %v3206_v15 = vmax.f32 %v3191_v13, %v740_v31  ;;  %v746_v8 = vpop.xlane.xlu1 %745  ;;  %3840 = vst [vmem:[#allocation19_spill] sm:$0xff] %v3231_v53  ;;  %v3238_v31 = vld [vmem:[#allocation2 + $0x38] sm:$0xff] }
 0x1b2   :  { %v3209_v19 = vmax.f32 %v3198_v50, %v746_v8  ;;  %3841 = vst [vmem:[#allocation20_spill] sm:$0xff] %v3238_v31  ;;  %v3251_v50 = vld [vmem:[#allocation2 + $0x70] sm:$0xff] }
 0x1b3   :  { %3834 = vst [vmem:[#allocation13_spill] sm:$0xff] %v3206_v15  ;;  %1052 = vst.msk [vmem:[#allocation2 + $0x40] sm:$0xff] %vm28_vm1, %v3206_v15  ;;  %853 = vperm.xlu0 %2264, %v3170_v12  }
 0x1b4   :  { %3835 = vst [vmem:[#allocation14_spill] sm:$0xff] %v3209_v19  ;;  %1055 = vst.msk [vmem:[#allocation2 + $0x58] sm:$0xff] %vm28_vm1, %v3209_v19  ;;  %v726_v8 = vpop.xlane.xlu0 %725  ;;  %908 = vperm.xlu1 %2265, %v3209_v19  }
 0x1b5   :  { %v3226_v52 = vmax.f32 %v3211_v3, %v726_v8  ;;  %v742_v10 = vpop.xlane.xlu1 %741  ;;  %3844 = vst [vmem:[#allocation23_spill] sm:$0xff] %v3251_v50  ;;  %v3258_v8 = vld [vmem:[#allocation2 + $0x78] sm:$0xff] }
 0x1b6   :  { %v3229_v13 = vmax.f32 %v3218_v48, %v742_v10  ;;  %3845 = vst [vmem:[#allocation24_spill] sm:$0xff] %v3258_v8 }
 0x1b7   :  { %3838 = vst [vmem:[#allocation17_spill] sm:$0xff] %v3226_v52  ;;  %1045 = vst.msk [vmem:[#allocation2 + $0x8] sm:$0xff] %vm28_vm1, %v3226_v52  ;;  %893 = vperm.xlu0 %2264, %v3206_v15  }
 0x1b8   :  { %3839 = vst [vmem:[#allocation18_spill] sm:$0xff] %v3229_v13  ;;  %1053 = vst.msk [vmem:[#allocation2 + $0x48] sm:$0xff] %vm28_vm1, %v3229_v13  ;;  %v736_v10 = vpop.xlane.xlu0 %735  ;;  %858 = vperm.xlu1 %2265, %v3226_v52   ;;  %v3271_v52 = vld [vmem:[#allocation2 + $0x20] sm:$0xff] }
 0x1b9   :  { %v3246_v19 = vmax.f32 %v3231_v53, %v736_v10  ;;  %v738_v12 = vpop.xlane.xlu1 %737  ;;  %3848 = vst [vmem:[#allocation27_spill] sm:$0xff] %v3271_v52  ;;  %v3278_v10 = vld [vmem:[#allocation2 + $0x28] sm:$0xff] }
 0x1ba   :  { %v3249_v3 = vmax.f32 %v3238_v31, %v738_v12  ;;  %3849 = vst [vmem:[#allocation28_spill] sm:$0xff] %v3278_v10 }
 0x1bb   :  { %3842 = vst [vmem:[#allocation21_spill] sm:$0xff] %v3246_v19  ;;  %1050 = vst.msk [vmem:[#allocation2 + $0x30] sm:$0xff] %vm28_vm1, %v3246_v19  ;;  %883 = vperm.xlu0 %2264, %v3246_v19  }
 0x1bc   :  { %3843 = vst [vmem:[#allocation22_spill] sm:$0xff] %v3249_v3  ;;  %1051 = vst.msk [vmem:[#allocation2 + $0x38] sm:$0xff] %vm28_vm1, %v3249_v3  ;;  %v752_v12 = vpop.xlane.xlu0 %751  ;;  %898 = vperm.xlu1 %2265, %v3229_v13   ;;  %v3291_v13 = vld [vmem:[#allocation2 + $0x60] sm:$0xff] }
 0x1bd   :  { %v3266_v48 = vmax.f32 %v3251_v50, %v752_v12  ;;  %v754_v15 = vpop.xlane.xlu1 %753  ;;  %3852 = vst [vmem:[#allocation31_spill] sm:$0xff] %v3291_v13  ;;  %v3298_v12 = vld [vmem:[#allocation2 + $0x68] sm:$0xff] }
 0x1be   :  { %v3269_v53 = vmax.f32 %v3258_v8, %v754_v15  ;;  %3853 = vst [vmem:[#allocation32_spill] sm:$0xff] %v3298_v12 }
 0x1bf   :  { %3846 = vst [vmem:[#allocation25_spill] sm:$0xff] %v3266_v48  ;;  %1058 = vst.msk [vmem:[#allocation2 + $0x70] sm:$0xff] %vm28_vm1, %v3266_v48  ;;  %923 = vperm.xlu0 %2264, %v3266_v48  }
 0x1c0   :  { %3847 = vst [vmem:[#allocation26_spill] sm:$0xff] %v3269_v53  ;;  %1059 = vst.msk [vmem:[#allocation2 + $0x78] sm:$0xff] %vm28_vm1, %v3269_v53  ;;  %v732_v15 = vpop.xlane.xlu0 %731  ;;  %888 = vperm.xlu1 %2265, %v3249_v3   ;;  %v1063_v3 = vld [vmem:[#allocation4 + $0x18] sm:$0xff] }
 0x1c1   :  { %v3286_v31 = vmax.f32 %v3271_v52, %v732_v15  ;;  %v734_v19 = vpop.xlane.xlu1 %733  ;;  %v3856_v15 = vsel %vm2709_vm2, %v2628_v59, 0.0  ;;  %vm3859_vm2 = vnez %v3791_v20 }
 0x1c2   :  { %v3289_v50 = vmax.f32 %v3278_v10, %v734_v19  ;;  %v3860_v17 = vsel %vm3859_vm2, %v2628_v59, 0.0 }
 0x1c3   :  { %3850 = vst [vmem:[#allocation29_spill] sm:$0xff] %v3286_v31  ;;  %1048 = vst.msk [vmem:[#allocation2 + $0x20] sm:$0xff] %vm28_vm1, %v3286_v31  ;;  %873 = vperm.xlu0 %2264, %v3286_v31  }
 0x1c4   :  { %3851 = vst [vmem:[#allocation30_spill] sm:$0xff] %v3289_v50  ;;  %1049 = vst.msk [vmem:[#allocation2 + $0x28] sm:$0xff] %vm28_vm1, %v3289_v50  ;;  %v748_v19 = vpop.xlane.xlu0 %747  ;;  %928 = vperm.xlu1 %2265, %v3269_v53  }
 0x1c5   :  { %v3306_v8 = vmax.f32 %v3291_v13, %v748_v19  ;;  %v750_v48 = vpop.xlane.xlu1 %749 }
 0x1c6   :  { %v3309_v52 = vmax.f32 %v3298_v12, %v750_v48  ;;  %v3330_v12 = vmul.f32 %v3130_v58, %v3856_v15  ;;  %v3866_v15 = vsel %vm2802_vm5, %v2628_v59, 0.0 }
 0x1c7   :  { %3854 = vst [vmem:[#allocation33_spill] sm:$0xff] %v3306_v8  ;;  %1056 = vst.msk [vmem:[#allocation2 + $0x60] sm:$0xff] %vm28_vm1, %v3306_v8  ;;  %913 = vperm.xlu0 %2264, %v3306_v8  }
 0x1c8   :  { %3855 = vst [vmem:[#allocation34_spill] sm:$0xff] %v3309_v52  ;;  %1057 = vst.msk [vmem:[#allocation2 + $0x68] sm:$0xff] %vm28_vm1, %v3309_v52  ;;  %v1083_v19 = vpop.xlane.xlu0 %1082  ;;  %878 = vperm.xlu1 %2265, %v3289_v50  }
 0x1c9   :  { %v1111_v48 = vadd.f32 %v1083_v19, %v1063_v3  ;;  %v674_v53 = vpop.permute.xlu1 %673  ;;  %v3857_v19 = vsel %vm2689_vm13, %v2628_v59, 0.0  ;;  %vm3861_vm13 = vnez %v3799_v34 }
 0x1ca   :  { %v3862_v11 = vsel %vm3861_vm13, %v2628_v59, 0.0 }
 0x1cb   :  { %1127 = vst.msk [vmem:[#allocation4 + $0x18] sm:$0xff] %vm28_vm1, %v1111_v48 }
 0x1cc   :  { %918 = vperm.xlu1 %2265, %v3309_v52   ;;  %v3858_v52 = vsel %vm2759_vm12, %v2628_v59, 0.0  ;;  %vm3863_vm12 = vnez %v3793_v25  ;;  %v1157_v25 = vmul.f32 %v2852_v57, %v2972_v2  ;;  %v1158_v57 = vmul.f32 %v2884_v29, %v2962_v44 }
 0x1d0   :  { %v634_v31 = vpop.permute.xlu0 %633 }
 0x1d1   :  { %v695_v48 = vmul.f32 %v634_v31, %v3857_v19 }
 0x1d3   :  { %v1160_v51 = vmul.f32 %v695_v48, %v3079_v40 }
 0x1d4   :  { %v644_v13 = vpop.permute.xlu0 %643 }
 0x1d5   :  { %v3347_v58 = vmul.f32 %v644_v13, %v3860_v17  ;;  %v3865_v13 = vsel %vm2826_vm4, %v2628_v59, 0.0 }
 0x1d8   :  { %v654_v10 = vpop.permute.xlu0 %653 }
 0x1dc   :  { %v664_v8 = vpop.permute.xlu0 %663 }
 0x1e0   :  { %v669_v3 = vpop.permute.xlu0 %668 }
 0x1e1   :  { %v3341_v50 = vmul.f32 %v669_v3, %v3858_v52  ;;  %v3864_v52 = vsel %vm3863_vm12, %v2628_v59, 0.0  ;;  %v3375_v3 = vmul.f32 %v664_v8, %v3866_v15 }
 0x1e2   :  { %v3361_v20 = vmul.f32 %v654_v10, %v3864_v52  ;;  %v3385_v10 = vmul.f32 %v674_v53, %v3867_v43 }
 0x1e4   :  { %v684_v19 = vpop.permute.xlu0 %683 }
 0x1e5   :  { %v3392_v8 = vmul.f32 %v684_v19, %v3868_v37 }
 0x1e6   :  { %1086 = vadd.xlane.f32.xlu0 %v2882_v22  ;;  %v679_v22 = vpop.permute.xlu1 %678 }
 0x1e7   :  { %v3354_v31 = vmul.f32 %v679_v22, %v3862_v11 }
 0x1ea   :  { %1090 = vadd.xlane.f32.xlu0 %v2891_v33  ;;  %v689_v28 = vpop.permute.xlu1 %688 }
 0x1eb   :  { %v3368_v34 = vmul.f32 %v689_v28, %v3865_v13 }
 0x1ee   :  { %1094 = vadd.xlane.f32.xlu0 %v3330_v12 }
 0x1f0   :  { %1084 = vadd.xlane.f32.xlu1 %v695_v48 }
 0x1f2   :  { %1098 = vadd.xlane.f32.xlu0 %v3341_v50 }
 0x1f4   :  { %1088 = vadd.xlane.f32.xlu1 %v3347_v58 }
 0x1f6   :  { %1102 = vadd.xlane.f32.xlu0 %v3354_v31 }
 0x1f8   :  { %1092 = vadd.xlane.f32.xlu1 %v3361_v20 }
 0x1fa   :  { %1106 = vadd.xlane.f32.xlu0 %v3368_v34 }
 0x1fc   :  { %1096 = vadd.xlane.f32.xlu1 %v3375_v3 }
 0x1fe   :  { %1174 = vadd.xlane.f32.xlu0 %v1157_v25 }
 0x200   :  { %1100 = vadd.xlane.f32.xlu1 %v3385_v10 }
 0x202   :  { %1178 = vadd.xlane.f32.xlu0 %v3012_v54 }
 0x204   :  { %1104 = vadd.xlane.f32.xlu1 %v3392_v8 }
 0x206   :  { %1182 = vadd.xlane.f32.xlu0 %v3049_v0 }
 0x208   :  { %1172 = vadd.xlane.f32.xlu1 %v1156_v45 }
 0x20c   :  { %1176 = vadd.xlane.f32.xlu1 %v1158_v57 }
 0x210   :  { %1180 = vadd.xlane.f32.xlu1 %v1160_v51 }
 0x22a   :  { %v864_v59 = vpop.permute.xlu0 %863 }
 0x22b   :  { %v933_v2 = vsub.f32 %v2983_v42, %v864_v59 }
 0x22d   :  { %v951_v53 = vmul.f32 1.442695, %v933_v2 }
 0x22e   :  { %v904_v54 = vpop.permute.xlu0 %903 }
 0x22f   :  { %2282 = vpow2.f32 %v951_v53  ;;  %v941_v22 = vsub.f32 %v3007_v60, %v904_v54  ;;  %v869_v0 = vpop.permute.xlu1 %868 }
 0x230   :  { %v934_v5 = vsub.f32 %v3020_v23, %v869_v0 }
 0x231   :  { %v967_v17 = vmul.f32 1.442695, %v941_v22 }
 0x232   :  { %v854_v4 = vpop.permute.xlu0 %853  ;;  %v953_v40 = vmul.f32 1.442695, %v934_v5 }
 0x233   :  { %2284 = vpow2.f32 %v967_v17  ;;  %v931_v29 = vsub.f32 %v2999_v63, %v854_v4  ;;  %v909_v44 = vpop.permute.xlu1 %908 }
 0x234   :  { %v942_v48 = vsub.f32 %v3041_v56, %v909_v44 }
 0x235   :  { %v947_v11 = vmul.f32 1.442695, %v931_v29 }
 0x236   :  { %v894_v28 = vpop.permute.xlu0 %893  ;;  %v969_v23 = vmul.f32 1.442695, %v942_v48 }
 0x237   :  { %2286 = vpow2.f32 %v947_v11  ;;  %v939_v42 = vsub.f32 %v3032_v24, %v894_v28  ;;  %v859_v52 = vpop.permute.xlu1 %858 }
 0x238   :  { %v932_v60 = vsub.f32 %v3056_v32, %v859_v52  ;;  %2288 = vpow2.f32 %v953_v40 }
 0x239   :  { %v2283_v13 = vpop.eup %2282  ;;  %v963_v15 = vmul.f32 1.442695, %v939_v42 }
 0x23a   :  { %v884_v25 = vpop.permute.xlu0 %883  ;;  %983 = vadd.xlane.f32.xlu0 %v2283_v13  ;;  %v949_v63 = vmul.f32 1.442695, %v932_v60 }
 0x23b   :  { %2290 = vpow2.f32 %v963_v15  ;;  %v937_v43 = vsub.f32 %v3068_v36, %v884_v25  ;;  %v899_v19 = vpop.permute.xlu1 %898 }
 0x23c   :  { %v940_v56 = vsub.f32 %v3062_v14, %v899_v19  ;;  %2292 = vpow2.f32 %v969_v23  ;;  %v1163_v19 = vmul.f32 %v2891_v33, %v3026_v21  ;;  %v1169_v33 = vmul.f32 %v3354_v31, %v3097_v49  ;;  %v1064_v31 = vld [vmem:[#allocation4 + $0x20] sm:$0xff] }
 0x23d   :  { %v2285_v37 = vpop.eup %2284  ;;  %v959_v45 = vmul.f32 1.442695, %v937_v43  ;;  %2294 = vpow2.f32 %v949_v63 }
 0x23e   :  { %v924_v24 = vpop.permute.xlu0 %923  ;;  %999 = vadd.xlane.f32.xlu1 %v2285_v37  ;;  %v965_v32 = vmul.f32 1.442695, %v940_v56  ;;  %v1164_v56 = vmul.f32 %v3361_v20, %v2978_v39  ;;  %v1165_v37 = vmul.f32 %v3330_v12, %v2974_v6  ;;  %v1170_v39 = vmul.f32 %v3392_v8, %v3044_v46  ;;  %v1065_v6 = vld [vmem:[#allocation4 + $0x28] sm:$0xff]  ;;  %v1067_v12 = vld [vmem:[#allocation4 + $0x38] sm:$0xff]  ;;  %v1066_v8 = vld [vmem:[#allocation4 + $0x30] sm:$0xff] }
 0x23f   :  { %v945_v57 = vsub.f32 %v3086_v7, %v924_v24  ;;  %v889_v51 = vpop.permute.xlu1 %888  ;;  %2296 = vpow2.f32 %v959_v45  ;;  %v1166_v45 = vmul.f32 %v3375_v3, %v2964_v47  ;;  %v1171_v47 = vmul.f32 %v3368_v34, %v3051_v38  ;;  %v1069_v20 = vld [vmem:[#allocation4 + $0x48] sm:$0xff] }
 0x240   :  { %v938_v59 = vsub.f32 %v3075_v16, %v889_v51  ;;  %2298 = vpow2.f32 %v965_v32 }
 0x241   :  { %v2287_v2 = vpop.eup %2286  ;;  %v975_v53 = vmul.f32 1.442695, %v945_v57  ;;  %v1073_v57 = vld [vmem:[#allocation4 + $0x68] sm:$0xff] }
 0x242   :  { %v874_v54 = vpop.permute.xlu0 %873  ;;  %979 = vadd.xlane.f32.xlu0 %v2287_v2  ;;  %v961_v36 = vmul.f32 1.442695, %v938_v59  ;;  %v2289_v0 = vpop.eup %2288  ;;  %v1068_v2 = vld [vmem:[#allocation4 + $0x40] sm:$0xff] }
 0x243   :  { %v935_v14 = vsub.f32 %v3104_v35, %v874_v54  ;;  %v929_v22 = vpop.permute.xlu1 %928  ;;  %2300 = vpow2.f32 %v975_v53 }
 0x244   :  { %v946_v17 = vsub.f32 %v3091_v62, %v929_v22  ;;  %2302 = vpow2.f32 %v961_v36  ;;  %v1075_v36 = vld [vmem:[#allocation4 + $0x78] sm:$0xff] }
 0x245   :  { %v2291_v5 = vpop.eup %2290  ;;  %v955_v4 = vmul.f32 1.442695, %v935_v14 }
 0x246   :  { %v914_v7 = vpop.permute.xlu0 %913  ;;  %995 = vadd.xlane.f32.xlu1 %v2291_v5  ;;  %985 = vadd.xlane.f32.xlu0 %v2289_v0  ;;  %v977_v16 = vmul.f32 1.442695, %v946_v17  ;;  %v2293_v11 = vpop.eup %2292  ;;  %v1070_v0 = vld [vmem:[#allocation4 + $0x50] sm:$0xff] }
 0x247   :  { %v943_v29 = vsub.f32 %v3120_v1, %v914_v7  ;;  %v879_v44 = vpop.permute.xlu1 %878  ;;  %v2295_v48 = vpop.eup %2294  ;;  %2304 = vpow2.f32 %v955_v4  ;;  %v1141_v4 = vld [vmem:[#allocation5 + $0x8] sm:$0xff] }
 0x248   :  { %v936_v40 = vsub.f32 %v3114_v27, %v879_v44  ;;  %2306 = vpow2.f32 %v977_v16 }
 0x249   :  { %v971_v35 = vmul.f32 1.442695, %v943_v29  ;;  %v2297_v42 = vpop.eup %2296  ;;  %v1072_v29 = vld [vmem:[#allocation4 + $0x60] sm:$0xff] }
 0x24a   :  { %1001 = vadd.xlane.f32.xlu0 %v2293_v11  ;;  %981 = vadd.xlane.f32.xlu1 %v2295_v48  ;;  %v957_v62 = vmul.f32 1.442695, %v936_v40  ;;  %v2299_v60 = vpop.eup %2298  ;;  %v1143_v40 = vld [vmem:[#allocation5 + $0x18] sm:$0xff] }
 0x24b   :  { %v919_v28 = vpop.permute.xlu1 %918  ;;  %2308 = vpow2.f32 %v971_v35 }
 0x24c   :  { %v944_v52 = vsub.f32 %v3126_v9, %v919_v28  ;;  %2310 = vpow2.f32 %v957_v62  ;;  %v1162_v9 = vmul.f32 %v3347_v58, %v3024_v41  ;;  %v1168_v41 = vmul.f32 %v3385_v10, %v3093_v61  ;;  %v1071_v10 = vld [vmem:[#allocation4 + $0x58] sm:$0xff]  ;;  %v1074_v62 = vld [vmem:[#allocation4 + $0x70] sm:$0xff] }
 0x24d   :  { %v2301_v13 = vpop.eup %2300  ;;  %v1167_v58 = vmul.f32 %v3341_v50, %v2993_v30 }
 0x24e   :  { %991 = vadd.xlane.f32.xlu1 %v2297_v42  ;;  %997 = vadd.xlane.f32.xlu0 %v2299_v60  ;;  %v973_v1 = vmul.f32 1.442695, %v944_v52  ;;  %v2303_v15 = vpop.eup %2302  ;;  %v1145_v52 = vld [vmem:[#allocation5 + $0x28] sm:$0xff] }
 0x250   :  { %2312 = vpow2.f32 %v973_v1 }
 0x251   :  { %v2305_v27 = vpop.eup %2304 }
 0x252   :  { %1007 = vadd.xlane.f32.xlu1 %v2301_v13  ;;  %993 = vadd.xlane.f32.xlu0 %v2303_v15  ;;  %v2307_v23 = vpop.eup %2306  ;;  %v1140_v13 = vld [vmem:[#allocation5] sm:$0xff] }
 0x255   :  { %v2309_v25 = vpop.eup %2308 }
 0x256   :  { %987 = vadd.xlane.f32.xlu1 %v2305_v27  ;;  %1009 = vadd.xlane.f32.xlu0 %v2307_v23  ;;  %v2311_v63 = vpop.eup %2310 }
 0x25a   :  { %1003 = vadd.xlane.f32.xlu1 %v2309_v25  ;;  %989 = vadd.xlane.f32.xlu0 %v2311_v63  ;;  %v2313_v43 = vpop.eup %2312  ;;  %v1142_v25 = vld [vmem:[#allocation5 + $0x10] sm:$0xff] }
 0x25e   :  { %1184 = vadd.xlane.f32.xlu1 %v1162_v9  ;;  %1005 = vadd.xlane.f32.xlu0 %v2313_v43  ;;  %v1144_v43 = vld [vmem:[#allocation5 + $0x20] sm:$0xff] }
 0x262   :  { %1188 = vadd.xlane.f32.xlu1 %v1164_v56  ;;  %1186 = vadd.xlane.f32.xlu0 %v1163_v19 }
 0x266   :  { %1192 = vadd.xlane.f32.xlu1 %v1166_v45  ;;  %1190 = vadd.xlane.f32.xlu0 %v1165_v37  ;;  %v3869_v37 = vsub.f32 %v3162_v55, %v3167_v18 }
 0x268   :  { %v791_v45 = vmul.f32 1.442695, %v3869_v37  ;;  %v3899_v37 = vld [vmem:[#allocation24_spill] sm:$0xff] }
 0x26a   :  { %1196 = vadd.xlane.f32.xlu1 %v1168_v41  ;;  %1194 = vadd.xlane.f32.xlu0 %v1167_v58  ;;  %2314 = vpow2.f32 %v791_v45  ;;  %v3870_v41 = vld [vmem:[#allocation9_spill] sm:$0xff]  ;;  %v3900_v45 = vld [vmem:[#allocation26_spill] sm:$0xff] }
 0x26b   :  { %v3871_v58 = vsub.f32 %v3172_v26, %v3870_v41  ;;  %v3882_v26 = vld [vmem:[#allocation14_spill] sm:$0xff]  ;;  %v3901_v41 = vsub.f32 %v3899_v37, %v3900_v45 }
 0x26e   :  { %1200 = vadd.xlane.f32.xlu1 %v1170_v39  ;;  %1198 = vadd.xlane.f32.xlu0 %v1169_v33  ;;  %v807_v33 = vmul.f32 1.442695, %v3871_v58  ;;  %v3872_v39 = vld [vmem:[#allocation6_spill] sm:$0xff]  ;;  %v817_v58 = vmul.f32 1.442695, %v3901_v41 }
 0x270   :  { %2316 = vpow2.f32 %v807_v33 }
 0x272   :  { %1202 = vadd.xlane.f32.xlu0 %v1171_v47  ;;  %v3873_v47 = vld [vmem:[#allocation7_spill] sm:$0xff] }
 0x273   :  { %v1087_v21 = vpop.xlane.xlu0 %1086 }
 0x274   :  { %v1113_v61 = vadd.f32 %v1087_v21, %v1065_v6  ;;  %v3874_v6 = vsub.f32 %v3872_v39, %v3873_v47  ;;  %v2315_v18 = vpop.eup %2314  ;;  %v3902_v39 = vld [vmem:[#allocation27_spill] sm:$0xff]  ;;  %v3903_v47 = vld [vmem:[#allocation29_spill] sm:$0xff] }
 0x276   :  { %1129 = vst.msk [vmem:[#allocation4 + $0x28] sm:$0xff] %vm28_vm1, %v1113_v61  ;;  %v787_v21 = vmul.f32 1.442695, %v3874_v6  ;;  %v3875_v61 = vld [vmem:[#allocation8_spill] sm:$0xff]  ;;  %v3904_v6 = vsub.f32 %v3902_v39, %v3903_v47 }
 0x277   :  { %v1091_v30 = vpop.xlane.xlu0 %1090 }
 0x278   :  { %v1115_v50 = vadd.f32 %v1091_v30, %v1067_v12  ;;  %v3876_v12 = vld [vmem:[#allocation10_spill] sm:$0xff]  ;;  %2318 = vpow2.f32 %v787_v21  ;;  %v795_v21 = vmul.f32 1.442695, %v3904_v6 }
 0x279   :  { %v3877_v30 = vsub.f32 %v3875_v61, %v3876_v12 }
 0x27a   :  { %1131 = vst.msk [vmem:[#allocation4 + $0x38] sm:$0xff] %vm28_vm1, %v1115_v50 }
 0x27b   :  { %v1095_v49 = vpop.xlane.xlu0 %1094  ;;  %v793_v50 = vmul.f32 1.442695, %v3877_v30  ;;  %v3508_v30 = vld [vmem:[#allocation4 + $0x18] sm:$0xff] }
 0x27c   :  { %v1117_v46 = vadd.f32 %v1095_v49, %v1069_v20  ;;  %v3878_v20 = vld [vmem:[#allocation11_spill] sm:$0xff]  ;;  %v3879_v49 = vld [vmem:[#allocation13_spill] sm:$0xff]  ;;  %vm2010_vm0 = vcmp.lt.f32.partialorder %v3508_v30, 1e-06 }
 0x27d   :  { %v1085_v3 = vpop.xlane.xlu1 %1084  ;;  %2320 = vpow2.f32 %v793_v50 }
 0x27e   :  { %1133 = vst.msk [vmem:[#allocation4 + $0x48] sm:$0xff] %vm28_vm1, %v1117_v46  ;;  %v1112_v38 = vadd.f32 %v1085_v3, %v1064_v31  ;;  %v3880_v31 = vsub.f32 %v3878_v20, %v3879_v49  ;;  %v821_v46 = vld [vmem:[#allocation3 + $0x10] sm:$0xff] }
 0x27f   :  { %v1099_v34 = vpop.xlane.xlu0 %1098  ;;  %v3881_v3 = vld [vmem:[#allocation12_spill] sm:$0xff] }
 0x280   :  { %1128 = vst.msk [vmem:[#allocation4 + $0x20] sm:$0xff] %vm28_vm1, %v1112_v38  ;;  %v1119_v24 = vadd.f32 %v1099_v34, %v1071_v10  ;;  %v803_v55 = vmul.f32 1.442695, %v3880_v31  ;;  %v3883_v10 = vsub.f32 %v3881_v3, %v3882_v26  ;;  %v3474_v34 = vld [vmem:[#allocation4 + $0x8] sm:$0xff] }
 0x281   :  { %v1089_v32 = vpop.xlane.xlu1 %1088  ;;  %vm2008_vm7 = vcmp.lt.f32.partialorder %v3474_v34, 1e-06 }
 0x282   :  { %1135 = vst.msk [vmem:[#allocation4 + $0x58] sm:$0xff] %vm28_vm1, %v1119_v24  ;;  %v1114_v51 = vadd.f32 %v1089_v32, %v1066_v8  ;;  %v809_v38 = vmul.f32 1.442695, %v3883_v10  ;;  %2322 = vpow2.f32 %v803_v55  ;;  %v3884_v8 = vld [vmem:[#allocation15_spill] sm:$0xff]  ;;  %v3885_v24 = vld [vmem:[#allocation17_spill] sm:$0xff]  ;;  %v3905_v55 = vld [vmem:[#allocation28_spill] sm:$0xff] }
 0x283   :  { %v1103_v59 = vpop.xlane.xlu0 %1102  ;;  %v3886_v32 = vsub.f32 %v3884_v8, %v3885_v24  ;;  %v820_v8 = vld [vmem:[#allocation3 + $0x8] sm:$0xff] }
 0x284   :  { %1130 = vst.msk [vmem:[#allocation4 + $0x30] sm:$0xff] %vm28_vm1, %v1114_v51  ;;  %v1121_v53 = vadd.f32 %v1103_v59, %v1073_v57  ;;  %v837_v51 = vmul.f32 %v2315_v18, %v821_v46  ;;  %v2317_v59 = vpop.eup %2316  ;;  %2324 = vpow2.f32 %v809_v38  ;;  %v3906_v18 = vld [vmem:[#allocation30_spill] sm:$0xff]  ;;  %v830_v38 = vld [vmem:[#allocation3 + $0x58] sm:$0xff]  ;;  %v3908_v24 = vld [vmem:[#allocation31_spill] sm:$0xff] }
 0x285   :  { %v1093_v54 = vpop.xlane.xlu1 %1092  ;;  %v789_v57 = vmul.f32 1.442695, %v3886_v32  ;;  %v3907_v46 = vsub.f32 %v3905_v55, %v3906_v18  ;;  %v3909_v32 = vld [vmem:[#allocation33_spill] sm:$0xff] }
 0x286   :  { %1137 = vst.msk [vmem:[#allocation4 + $0x68] sm:$0xff] %vm28_vm1, %v1121_v53  ;;  %v1116_v14 = vadd.f32 %v1093_v54, %v1068_v2  ;;  %v829_v53 = vld [vmem:[#allocation3 + $0x50] sm:$0xff] }
 0x287   :  { %v1107_v22 = vpop.xlane.xlu0 %1106  ;;  %v3887_v54 = vld [vmem:[#allocation16_spill] sm:$0xff]  ;;  %2326 = vpow2.f32 %v789_v57  ;;  %v797_v3 = vmul.f32 1.442695, %v3907_v46  ;;  %v3910_v57 = vsub.f32 %v3908_v24, %v3909_v32  ;;  %v834_v46 = vld [vmem:[#allocation3 + $0x78] sm:$0xff] }
 0x288   :  { %1132 = vst.msk [vmem:[#allocation4 + $0x40] sm:$0xff] %vm28_vm1, %v1116_v14  ;;  %v1123_v17 = vadd.f32 %v1107_v22, %v1075_v36  ;;  %v3888_v36 = vld [vmem:[#allocation18_spill] sm:$0xff] }
 0x289   :  { %v1097_v5 = vpop.xlane.xlu1 %1096  ;;  %v3889_v14 = vsub.f32 %v3887_v54, %v3888_v36  ;;  %v3911_v54 = vld [vmem:[#allocation32_spill] sm:$0xff]  ;;  %v3912_v36 = vld [vmem:[#allocation34_spill] sm:$0xff] }
 0x28a   :  { %1139 = vst.msk [vmem:[#allocation4 + $0x78] sm:$0xff] %vm28_vm1, %v1123_v17  ;;  %v1118_v7 = vadd.f32 %v1097_v5, %v1070_v0  ;;  %v3483_v17 = vld [vmem:[#allocation4] sm:$0xff]  ;;  %v3890_v5 = vld [vmem:[#allocation19_spill] sm:$0xff] }
 0x28b   :  { %v1175_v16 = vpop.xlane.xlu0 %1174  ;;  %v805_v22 = vmul.f32 1.442695, %v3889_v14  ;;  %vm2007_vm4 = vcmp.lt.f32.partialorder %v3483_v17, 1e-06  ;;  %v3913_v14 = vsub.f32 %v3911_v54, %v3912_v36  ;;  %v3561_v32 = vld [vmem:[#allocation4 + $0x30] sm:$0xff] }
 0x28c   :  { %1134 = vst.msk [vmem:[#allocation4 + $0x50] sm:$0xff] %vm28_vm1, %v1118_v7  ;;  %v1205_v44 = vadd.f32 %v1175_v16, %v1141_v4  ;;  %v3891_v4 = vld [vmem:[#allocation21_spill] sm:$0xff]  ;;  %vm2013_vm8 = vcmp.lt.f32.partialorder %v3561_v32, 1e-06 }
 0x28d   :  { %v1101_v11 = vpop.xlane.xlu1 %1100  ;;  %v3892_v7 = vsub.f32 %v3890_v5, %v3891_v4  ;;  %2328 = vpow2.f32 %v805_v22  ;;  %v813_v22 = vmul.f32 1.442695, %v3913_v14  ;;  %v3524_v5 = vld [vmem:[#allocation4 + $0x38] sm:$0xff] }
 0x28e   :  { %1221 = vst.msk [vmem:[#allocation5 + $0x8] sm:$0xff] %vm28_vm1, %v1205_v44  ;;  %v1120_v48 = vadd.f32 %v1101_v11, %v1072_v29  ;;  %v845_v29 = vmul.f32 %v2317_v59, %v829_v53  ;;  %v2319_v44 = vpop.eup %2318  ;;  %v2024_v11 = vsel %vm2008_vm7, 1.0, %v3474_v34  ;;  %v3518_v59 = vld [vmem:[#allocation4 + $0x28] sm:$0xff]  ;;  %vm2014_vm6 = vcmp.lt.f32.partialorder %v3524_v5, 1e-06 }
 0x28f   :  { %v1179_v35 = vpop.xlane.xlu0 %1178  ;;  %v799_v16 = vmul.f32 1.442695, %v3892_v7  ;;  %vm2012_vm10 = vcmp.lt.f32.partialorder %v3518_v59, 1e-06  ;;  %v2030_v37 = vsel %vm2014_vm6, 1.0, %v3524_v5 }
 0x290   :  { %1136 = vst.msk [vmem:[#allocation4 + $0x60] sm:$0xff] %vm28_vm1, %v1120_v48  ;;  %v1207_v28 = vadd.f32 %v1179_v35, %v1143_v40  ;;  %v819_v48 = vld [vmem:[#allocation3] sm:$0xff]  ;;  %v3893_v35 = vld [vmem:[#allocation20_spill] sm:$0xff] }
 0x291   :  { %v1105_v42 = vpop.xlane.xlu1 %1104  ;;  %2330 = vpow2.f32 %v799_v16  ;;  %v828_v16 = vld [vmem:[#allocation3 + $0x48] sm:$0xff] }
 0x292   :  { %1223 = vst.msk [vmem:[#allocation5 + $0x18] sm:$0xff] %vm28_vm1, %v1207_v28  ;;  %v1122_v60 = vadd.f32 %v1105_v42, %v1074_v62  ;;  %v3894_v62 = vld [vmem:[#allocation22_spill] sm:$0xff]  ;;  %2332 = vrcp.f32 %v2024_v11 }
 0x293   :  { %v1183_v1 = vpop.xlane.xlu0 %1182  ;;  %v3895_v28 = vsub.f32 %v3893_v35, %v3894_v62  ;;  %v2026_v35 = vsel %vm2010_vm0, 1.0, %v3508_v30 }
 0x294   :  { %1138 = vst.msk [vmem:[#allocation4 + $0x70] sm:$0xff] %vm28_vm1, %v1122_v60  ;;  %v1209_v15 = vadd.f32 %v1183_v1, %v1145_v52  ;;  %v3494_v60 = vld [vmem:[#allocation4 + $0x10] sm:$0xff]  ;;  %v3896_v1 = vld [vmem:[#allocation23_spill] sm:$0xff] }
 0x295   :  { %v1173_v27 = vpop.xlane.xlu1 %1172  ;;  %v801_v42 = vmul.f32 1.442695, %v3895_v28  ;;  %vm2009_vm5 = vcmp.lt.f32.partialorder %v3494_v60, 1e-06 }
 0x296   :  { %1225 = vst.msk [vmem:[#allocation5 + $0x28] sm:$0xff] %vm28_vm1, %v1209_v15  ;;  %v1204_v23 = vadd.f32 %v1173_v27, %v1140_v13  ;;  %v3897_v13 = vld [vmem:[#allocation25_spill] sm:$0xff]  ;;  %v2025_v31 = vsel %vm2009_vm5, 1.0, %v3494_v60 }
 0x297   :  { %v3898_v15 = vsub.f32 %v3896_v1, %v3897_v13  ;;  %2334 = vpow2.f32 %v801_v42 }
 0x298   :  { %1220 = vst.msk [vmem:[#allocation5] sm:$0xff] %vm28_vm1, %v1204_v23  ;;  %v2321_v23 = vpop.eup %2320 }
 0x299   :  { %v1177_v63 = vpop.xlane.xlu1 %1176  ;;  %v815_v27 = vmul.f32 1.442695, %v3898_v15 }
 0x29a   :  { %v1206_v9 = vadd.f32 %v1177_v63, %v1142_v25  ;;  %v835_v25 = vmul.f32 %v2319_v44, %v819_v48  ;;  %v2323_v63 = vpop.eup %2322  ;;  %v3529_v44 = vld [vmem:[#allocation4 + $0x48] sm:$0xff]  ;;  %v825_v48 = vld [vmem:[#allocation3 + $0x30] sm:$0xff] }
 0x29b   :  { %2336 = vpow2.f32 %v815_v27  ;;  %v2325_v12 = vpop.eup %2324  ;;  %v2028_v27 = vsel %vm2012_vm10, 1.0, %v3518_v59  ;;  %vm2016_vm3 = vcmp.lt.f32.partialorder %v3529_v44, 1e-06 }
 0x29c   :  { %1222 = vst.msk [vmem:[#allocation5 + $0x10] sm:$0xff] %vm28_vm1, %v1206_v9  ;;  %v2023_v9 = vsel %vm2007_vm4, 1.0, %v3483_v17  ;;  %v2327_v49 = vpop.eup %2326  ;;  %v846_v4 = vmul.f32 %v2325_v12, %v830_v38 }
 0x29d   :  { %v1181_v19 = vpop.xlane.xlu1 %1180  ;;  %v836_v7 = vmul.f32 %v2327_v49, %v820_v8 }
 0x29e   :  { %v1208_v56 = vadd.f32 %v1181_v19, %v1144_v43  ;;  %v822_v19 = vld [vmem:[#allocation3 + $0x18] sm:$0xff] }
 0x29f   :  { %v838_v50 = vmul.f32 %v2321_v23, %v822_v19  ;;  %v833_v19 = vld [vmem:[#allocation3 + $0x70] sm:$0xff] }
 0x2a0   :  { %1224 = vst.msk [vmem:[#allocation5 + $0x20] sm:$0xff] %vm28_vm1, %v1208_v56  ;;  %v827_v56 = vld [vmem:[#allocation3 + $0x40] sm:$0xff] }
 0x2a1   :  { %v843_v20 = vmul.f32 %v2323_v63, %v827_v56 }
 0x2a3   :  { %v2041_v54 = vld [vmem:[#allocation5 + $0x10] sm:$0xff] }
 0x2c7   :  { %v984_v2 = vpop.xlane.xlu0 %983 }
 0x2c8   :  { %v1013_v0 = vadd.f32 %v984_v2, %v837_v51  ;;  %v811_v51 = vmul.f32 1.442695, %v3910_v57 }
 0x2ca   :  { %1030 = vst.msk [vmem:[#allocation3 + $0x10] sm:$0xff] %vm28_vm1, %v1013_v0  ;;  %v2329_v0 = vpop.eup %2328 }
 0x2cb   :  { %v1000_v40 = vpop.xlane.xlu1 %999  ;;  %v844_v13 = vmul.f32 %v2329_v0, %v828_v16  ;;  %v824_v0 = vld [vmem:[#allocation3 + $0x28] sm:$0xff] }
 0x2cc   :  { %v1021_v52 = vadd.f32 %v1000_v40, %v845_v29  ;;  %v2331_v29 = vpop.eup %2330 }
 0x2cd   :  { %v3534_v42 = vpop.eup %2332  ;;  %v841_v23 = vmul.f32 %v2331_v29, %v825_v48  ;;  %v3570_v48 = vld [vmem:[#allocation4 + $0x40] sm:$0xff] }
 0x2ce   :  { %1038 = vst.msk [vmem:[#allocation3 + $0x50] sm:$0xff] %vm28_vm1, %v1021_v52  ;;  %v3537_v52 = vld [vmem:[#allocation4 + $0x20] sm:$0xff]  ;;  %v2335_v15 = vpop.eup %2334  ;;  %vm2015_vm9 = vcmp.lt.f32.partialorder %v3570_v48, 1e-06 }
 0x2cf   :  { %v980_v43 = vpop.xlane.xlu0 %979  ;;  %vm2011_vm11 = vcmp.lt.f32.partialorder %v3537_v52, 1e-06 }
 0x2d0   :  { %v1011_v33 = vadd.f32 %v980_v43, %v835_v25  ;;  %v2337_v25 = vpop.eup %2336  ;;  %v826_v43 = vld [vmem:[#allocation3 + $0x38] sm:$0xff]  ;;  %v2027_v49 = vsel %vm2011_vm11, 1.0, %v3537_v52 }
 0x2d1   :  { %v1929_v61 = vld [vmem:[#allocation3 + $0x10] sm:$0xff]  ;;  %v842_v12 = vmul.f32 %v2335_v15, %v826_v43 }
 0x2d2   :  { %2338 = vlog2.f32 %v1929_v61  ;;  %1028 = vst.msk [vmem:[#allocation3] sm:$0xff] %vm28_vm1, %v1011_v33  ;;  %v2032_v33 = vsel %vm2016_vm3, 1.0, %v3529_v44 }
 0x2d3   :  { %2340 = vrcp.f32 %v2023_v9  ;;  %v986_v26 = vpop.xlane.xlu0 %985  ;;  %v996_v10 = vpop.xlane.xlu1 %995 }
 0x2d4   :  { %2342 = vpow2.f32 %v817_v58  ;;  %v1014_v2 = vadd.f32 %v986_v26, %v838_v50  ;;  %v1019_v53 = vadd.f32 %v996_v10, %v843_v20  ;;  %v849_v50 = vmul.f32 %v2337_v25, %v833_v19  ;;  %v3559_v10 = vld [vmem:[#allocation4 + $0x58] sm:$0xff] }
 0x2d5   :  { %2344 = vpow2.f32 %v795_v21  ;;  %v1913_v21 = vld [vmem:[#allocation2 + $0x10] sm:$0xff]  ;;  %vm2018_vm14 = vcmp.lt.f32.partialorder %v3559_v10, 1e-06 }
 0x2d6   :  { %2346 = vrcp.f32 %v2025_v31  ;;  %1031 = vst.msk [vmem:[#allocation3 + $0x18] sm:$0xff] %vm28_vm1, %v1014_v2  ;;  %1036 = vst.msk [vmem:[#allocation3 + $0x40] sm:$0xff] %vm28_vm1, %v1019_v53 }
 0x2d7   :  { %2348 = vpow2.f32 %v797_v3  ;;  %v1002_v11 = vpop.xlane.xlu0 %1001  ;;  %v982_v40 = vpop.xlane.xlu1 %981  ;;  %v823_v3 = vld [vmem:[#allocation3 + $0x20] sm:$0xff] }
 0x2d8   :  { %2350 = vpow2.f32 %v811_v51  ;;  %v1022_v62 = vadd.f32 %v1002_v11, %v846_v4  ;;  %v1012_v28 = vadd.f32 %v982_v40, %v836_v7  ;;  %v1937_v51 = vld [vmem:[#allocation3 + $0x50] sm:$0xff]  ;;  %v3567_v7 = vld [vmem:[#allocation4 + $0x68] sm:$0xff]  ;;  %v831_v11 = vld [vmem:[#allocation3 + $0x60] sm:$0xff] }
 0x2d9   :  { %2352 = vpow2.f32 %v813_v22  ;;  %v1927_v1 = vld [vmem:[#allocation3] sm:$0xff]  ;;  %vm2020_vm15 = vcmp.lt.f32.partialorder %v3567_v7, 1e-06 }
 0x2da   :  { %2354 = vlog2.f32 %v1927_v1  ;;  %1039 = vst.msk [vmem:[#allocation3 + $0x58] sm:$0xff] %vm28_vm1, %v1022_v62  ;;  %1029 = vst.msk [vmem:[#allocation3 + $0x8] sm:$0xff] %vm28_vm1, %v1012_v28  ;;  %v3574_v1 = vld [vmem:[#allocation4 + $0x78] sm:$0xff] }
 0x2db   :  { %2356 = vrcp.f32 %v2026_v35  ;;  %v998_v63 = vpop.xlane.xlu0 %997  ;;  %v992_v9 = vpop.xlane.xlu1 %991  ;;  %vm2022_vm2 = vcmp.lt.f32.partialorder %v3574_v1, 1e-06 }
 0x2dc   :  { %v2339_v56 = vpop.eup %2338  ;;  %v1020_v45 = vadd.f32 %v998_v63, %v844_v13  ;;  %v1017_v41 = vadd.f32 %v992_v9, %v841_v23  ;;  %2358 = vrcp.f32 %v2028_v27  ;;  %v1911_v63 = vld [vmem:[#allocation2] sm:$0xff]  ;;  %v2034_v9 = vsel %vm2018_vm14, 1.0, %v3559_v10 }
 0x2dd   :  { %v3549_v58 = vpop.eup %2340  ;;  %v1948_v39 = vmul.f32 0.6931472, %v2339_v56  ;;  %v1930_v47 = vld [vmem:[#allocation3 + $0x18] sm:$0xff]  ;;  %v1935_v61 = vld [vmem:[#allocation3 + $0x40] sm:$0xff]  ;;  %v3585_v56 = vld [vmem:[#allocation4 + $0x50] sm:$0xff] }
 0x2de   :  { %v2343_v6 = vpop.eup %2342  ;;  %2360 = vlog2.f32 %v1930_v47  ;;  %1037 = vst.msk [vmem:[#allocation3 + $0x48] sm:$0xff] %vm28_vm1, %v1020_v45  ;;  %1034 = vst.msk [vmem:[#allocation3 + $0x30] sm:$0xff] %vm28_vm1, %v1017_v41  ;;  %vm2017_vm13 = vcmp.lt.f32.partialorder %v3585_v56, 1e-06 }
 0x2df   :  { %v2345_v20 = vpop.eup %2344  ;;  %2362 = vrcp.f32 %v2030_v37  ;;  %v1977_v31 = vadd.f32 %v1948_v39, %v1913_v21  ;;  %v994_v55 = vpop.xlane.xlu0 %993  ;;  %v850_v14 = vmul.f32 %v2343_v6, %v834_v46  ;;  %v832_v39 = vld [vmem:[#allocation3 + $0x68] sm:$0xff]  ;;  %v2029_v6 = vsel %vm2013_vm8, 1.0, %v3561_v32  ;;  %v1914_v46 = vld [vmem:[#allocation2 + $0x18] sm:$0xff] }
 0x2e0   :  { %v1008_v18 = vpop.xlane.xlu1 %1007  ;;  %v2347_v26 = vpop.eup %2346  ;;  %2364 = vrcp.f32 %v2032_v33  ;;  %v1018_v38 = vadd.f32 %v994_v55, %v842_v12  ;;  %v839_v22 = vmul.f32 %v2345_v20, %v823_v3  ;;  %v1146_v55 = vld [vmem:[#allocation5 + $0x30] sm:$0xff]  ;;  %v2031_v3 = vsel %vm2015_vm9, 1.0, %v3570_v48 }
 0x2e1   :  { %v1025_v8 = vadd.f32 %v1008_v18, %v849_v50  ;;  %v2349_v24 = vpop.eup %2348  ;;  %v2057_v57 = vmul.f32 %v3494_v60, %v1977_v31  ;;  %2366 = vlog2.f32 %v1935_v61  ;;  %v1928_v2 = vld [vmem:[#allocation3 + $0x8] sm:$0xff]  ;;  %v1938_v36 = vld [vmem:[#allocation3 + $0x58] sm:$0xff]  ;;  %v2036_v50 = vsel %vm2020_vm15, 1.0, %v3567_v7 }
 0x2e2   :  { %v2351_v53 = vpop.eup %2350  ;;  %2368 = vrcp.f32 %v2027_v49  ;;  %1035 = vst.msk [vmem:[#allocation3 + $0x38] sm:$0xff] %vm28_vm1, %v1018_v38  ;;  %v840_v25 = vmul.f32 %v2349_v24, %v824_v0  ;;  %v1148_v0 = vld [vmem:[#allocation5 + $0x40] sm:$0xff] }
 0x2e3   :  { %1042 = vst.msk [vmem:[#allocation3 + $0x70] sm:$0xff] %vm28_vm1, %v1025_v8  ;;  %v2353_v4 = vpop.eup %2352  ;;  %v2073_v60 = vsub.f32 %v2041_v54, %v2057_v57  ;;  %2370 = vlog2.f32 %v1928_v2  ;;  %v1010_v16 = vpop.xlane.xlu0 %1009  ;;  %v847_v43 = vmul.f32 %v2351_v53, %v831_v11  ;;  %v2038_v8 = vsel %vm2022_vm2, 1.0, %v3574_v1  ;;  %v3614_v54 = vld [vmem:[#allocation4 + $0x60] sm:$0xff] }
 0x2e4   :  { %v988_v29 = vpop.xlane.xlu1 %987  ;;  %v2355_v40 = vpop.eup %2354  ;;  %2372 = vlog2.f32 %v1937_v51  ;;  %v1026_v35 = vadd.f32 %v1010_v16, %v850_v14  ;;  %v848_v38 = vmul.f32 %v2353_v4, %v832_v39  ;;  %v2042_v16 = vld [vmem:[#allocation5 + $0x18] sm:$0xff]  ;;  %vm2019_vm12 = vcmp.lt.f32.partialorder %v3614_v54, 1e-06 }
 0x2e5   :  { %v1015_v62 = vadd.f32 %v988_v29, %v839_v22  ;;  %v3572_v28 = vpop.eup %2356  ;;  %v2105_v13 = vmul.f32 %v2347_v26, %v2073_v60  ;;  %v1944_v15 = vmul.f32 0.6931472, %v2355_v40  ;;  %2374 = vlog2.f32 %v1938_v36  ;;  %v1936_v27 = vld [vmem:[#allocation3 + $0x48] sm:$0xff]  ;;  %v1933_v23 = vld [vmem:[#allocation3 + $0x30] sm:$0xff]  ;;  %v2039_v26 = vld [vmem:[#allocation5] sm:$0xff] }
 0x2e6   :  { %2376 = vlog2.f32 %v1936_v27  ;;  %1043 = vst.msk [vmem:[#allocation3 + $0x78] sm:$0xff] %vm28_vm1, %v1026_v35  ;;  %v3582_v19 = vpop.eup %2358  ;;  %v1147_v22 = vld [vmem:[#allocation5 + $0x38] sm:$0xff]  ;;  %v2033_v60 = vsel %vm2017_vm13, 1.0, %v3585_v56 }
 0x2e7   :  { %1032 = vst.msk [vmem:[#allocation3 + $0x20] sm:$0xff] %vm28_vm1, %v1015_v62  ;;  %v2121_v37 = vmul.f32 -1.0, %v2105_v13  ;;  %v1975_v45 = vadd.f32 %v1944_v15, %v1911_v63  ;;  %2378 = vlog2.f32 %v1933_v23  ;;  %v990_v41 = vpop.xlane.xlu0 %989  ;;  %v3621_v13 = vld [vmem:[#allocation4 + $0x70] sm:$0xff]  ;;  %v1912_v63 = vld [vmem:[#allocation2 + $0x8] sm:$0xff] }
 0x2e8   :  { %v1004_v33 = vpop.xlane.xlu1 %1003  ;;  %v2361_v47 = vpop.eup %2360  ;;  %v1016_v21 = vadd.f32 %v990_v41, %v840_v25  ;;  %2380 = vrcp.f32 %v2034_v9  ;;  %vm2021_vm7 = vcmp.lt.f32.partialorder %v3621_v13, 1e-06 }
 0x2e9   :  { %v1023_v61 = vadd.f32 %v1004_v33, %v847_v43  ;;  %v3591_v12 = vpop.eup %2362  ;;  %2138 = vst.msk [vmem:[%s3736_s6 + $0x10] sm:$0xff] %vm28_vm1, %v2121_v37  ;;  %v2055_v20 = vmul.f32 %v3483_v17, %v1975_v45  ;;  %v1950_v49 = vmul.f32 0.6931472, %v2361_v47  ;;  %v1934_v31 = vld [vmem:[#allocation3 + $0x38] sm:$0xff]  ;;  %v1919_v45 = vld [vmem:[#allocation2 + $0x40] sm:$0xff]  ;;  %v1149_v47 = vld [vmem:[#allocation5 + $0x48] sm:$0xff] }
 0x2ea   :  { %v3601_v18 = vpop.eup %2364  ;;  %2382 = vlog2.f32 %v1934_v31  ;;  %1033 = vst.msk [vmem:[#allocation3 + $0x28] sm:$0xff] %vm28_vm1, %v1016_v21  ;;  %v1941_v40 = vld [vmem:[#allocation3 + $0x70] sm:$0xff] }
 0x2eb   :  { %1040 = vst.msk [vmem:[#allocation3 + $0x60] sm:$0xff] %vm28_vm1, %v1023_v61  ;;  %v2367_v17 = vpop.eup %2366  ;;  %2384 = vrcp.f32 %v2029_v6  ;;  %v2071_v24 = vsub.f32 %v2039_v26, %v2055_v20  ;;  %v1978_v57 = vadd.f32 %v1950_v49, %v1914_v46  ;;  %v1006_v51 = vpop.xlane.xlu0 %1005  ;;  %v1150_v6 = vld [vmem:[#allocation5 + $0x50] sm:$0xff] }
 0x2ec   :  { %v1185_v2 = vpop.xlane.xlu1 %1184  ;;  %v3612_v53 = vpop.eup %2368  ;;  %2386 = vrcp.f32 %v2036_v50  ;;  %v1024_v36 = vadd.f32 %v1006_v51, %v848_v38  ;;  %v1960_v15 = vmul.f32 0.6931472, %v2367_v17  ;;  %v1917_v31 = vld [vmem:[#allocation2 + $0x30] sm:$0xff]  ;;  %v2040_v38 = vld [vmem:[#allocation5 + $0x8] sm:$0xff] }
 0x2ed   :  { %v1210_v14 = vadd.f32 %v1185_v2, %v1146_v55  ;;  %v2371_v4 = vpop.eup %2370  ;;  %2388 = vrcp.f32 %v2031_v3  ;;  %v2103_v29 = vmul.f32 %v3549_v58, %v2071_v24  ;;  %v2058_v11 = vmul.f32 %v3508_v30, %v1978_v57  ;;  %v1942_v23 = vld [vmem:[#allocation3 + $0x78] sm:$0xff]  ;;  %v1921_v2 = vld [vmem:[#allocation2 + $0x50] sm:$0xff] }
 0x2ee   :  { %v1931_v35 = vld [vmem:[#allocation3 + $0x20] sm:$0xff]  ;;  %v2373_v62 = vpop.eup %2372  ;;  %2390 = vrcp.f32 %v2038_v8  ;;  %v1946_v27 = vmul.f32 0.6931472, %v2371_v4  ;;  %1041 = vst.msk [vmem:[#allocation3 + $0x68] sm:$0xff] %vm28_vm1, %v1024_v36  ;;  %v1983_v3 = vadd.f32 %v1960_v15, %v1919_v45 }
 0x2ef   :  { %1226 = vst.msk [vmem:[#allocation5 + $0x30] sm:$0xff] %vm28_vm1, %v1210_v14  ;;  %v2375_v25 = vpop.eup %2374  ;;  %v2119_v58 = vmul.f32 -1.0, %v2103_v29  ;;  %v2074_v9 = vsub.f32 %v2042_v16, %v2058_v11  ;;  %2392 = vlog2.f32 %v1931_v35  ;;  %v1187_v30 = vpop.xlane.xlu0 %1186  ;;  %v1964_v61 = vmul.f32 0.6931472, %v2373_v62  ;;  %v1152_v4 = vld [vmem:[#allocation5 + $0x60] sm:$0xff] }
 0x2f0   :  { %v1189_v43 = vpop.xlane.xlu1 %1188  ;;  %v2377_v37 = vpop.eup %2376  ;;  %v1976_v41 = vadd.f32 %v1946_v27, %v1912_v63  ;;  %2394 = vlog2.f32 %v1941_v40  ;;  %v1211_v33 = vadd.f32 %v1187_v30, %v1147_v22  ;;  %v1966_v8 = vmul.f32 0.6931472, %v2375_v25  ;;  %v1922_v27 = vld [vmem:[#allocation2 + $0x58] sm:$0xff] }
 0x2f1   :  { %v1212_v39 = vadd.f32 %v1189_v43, %v1148_v0  ;;  %v2379_v21 = vpop.eup %2378  ;;  %2136 = vst.msk [vmem:[%s3736_s6] sm:$0xff] %vm28_vm1, %v2119_v58  ;;  %v2106_v50 = vmul.f32 %v3572_v28, %v2074_v9  ;;  %2396 = vlog2.f32 %v1942_v23  ;;  %v1932_v20 = vld [vmem:[#allocation3 + $0x28] sm:$0xff]  ;;  %v1962_v24 = vmul.f32 0.6931472, %v2377_v37  ;;  %v1151_v0 = vld [vmem:[#allocation5 + $0x58] sm:$0xff] }
 0x2f2   :  { %v1939_v49 = vld [vmem:[#allocation3 + $0x60] sm:$0xff]  ;;  %v2056_v55 = vmul.f32 %v3474_v34, %v1976_v41  ;;  %v1956_v46 = vmul.f32 0.6931472, %v2379_v21  ;;  %2398 = vlog2.f32 %v1932_v20  ;;  %1227 = vst.msk [vmem:[#allocation5 + $0x38] sm:$0xff] %vm28_vm1, %v1211_v33  ;;  %v3635_v26 = vpop.eup %2380  ;;  %v2035_v29 = vsel %vm2019_vm12, 1.0, %v3614_v54  ;;  %v1918_v23 = vld [vmem:[#allocation2 + $0x38] sm:$0xff] }
 0x2f3   :  { %1228 = vst.msk [vmem:[#allocation5 + $0x40] sm:$0xff] %vm28_vm1, %v1212_v39  ;;  %v2122_v17 = vmul.f32 -1.0, %v2106_v50  ;;  %2400 = vlog2.f32 %v1939_v49  ;;  %v1191_v28 = vpop.xlane.xlu0 %1190  ;;  %v2037_v11 = vsel %vm2021_vm7, 1.0, %v3621_v13  ;;  %v1985_v58 = vadd.f32 %v1964_v61, %v1921_v2  ;;  %v1153_v49 = vld [vmem:[#allocation5 + $0x68] sm:$0xff] }
 0x2f4   :  { %v1193_v57 = vpop.xlane.xlu1 %1192  ;;  %v2383_v51 = vpop.eup %2382  ;;  %v2072_v36 = vsub.f32 %v2040_v38, %v2056_v55  ;;  %v1981_v34 = vadd.f32 %v1956_v46, %v1917_v31  ;;  %v1213_v14 = vadd.f32 %v1191_v28, %v1149_v47  ;;  %2402 = vrcp.f32 %v2033_v60  ;;  %v1920_v60 = vld [vmem:[#allocation2 + $0x48] sm:$0xff] }
 0x2f5   :  { %v1214_v22 = vadd.f32 %v1193_v57, %v1150_v6  ;;  %v2385_v16 = vpop.eup %2384  ;;  %2139 = vst.msk [vmem:[%s3736_s6 + $0x18] sm:$0xff] %vm28_vm1, %v2122_v17  ;;  %v1958_v40 = vmul.f32 0.6931472, %v2383_v51  ;;  %v1940_v35 = vld [vmem:[#allocation3 + $0x68] sm:$0xff]  ;;  %v2063_v43 = vmul.f32 %v3570_v48, %v1983_v3  ;;  %v1984_v37 = vadd.f32 %v1962_v24, %v1920_v60  ;;  %v1154_v3 = vld [vmem:[#allocation5 + $0x70] sm:$0xff] }
 0x2f6   :  { %v2045_v62 = vld [vmem:[#allocation5 + $0x30] sm:$0xff]  ;;  %v3647_v15 = vpop.eup %2386  ;;  %v2104_v25 = vmul.f32 %v3534_v42, %v2072_v36  ;;  %2404 = vlog2.f32 %v1940_v35  ;;  %v2061_v63 = vmul.f32 %v3561_v32, %v1981_v34  ;;  %1229 = vst.msk [vmem:[#allocation5 + $0x48] sm:$0xff] %vm28_vm1, %v1213_v14  ;;  %v1986_v45 = vadd.f32 %v1966_v8, %v1922_v27 }
 0x2f7   :  { %1230 = vst.msk [vmem:[#allocation5 + $0x50] sm:$0xff] %vm28_vm1, %v1214_v22  ;;  %v2389_v9 = vpop.eup %2388  ;;  %v1982_v30 = vadd.f32 %v1958_v40, %v1918_v23  ;;  %v1195_v41 = vpop.xlane.xlu0 %1194  ;;  %2406 = vrcp.f32 %v2035_v29  ;;  %v2064_v8 = vmul.f32 %v3529_v44, %v1984_v37  ;;  %v2065_v24 = vmul.f32 %v3585_v56, %v1985_v58  ;;  %v1925_v37 = vld [vmem:[#allocation2 + $0x70] sm:$0xff] }
 0x2f8   :  { %v1197_v33 = vpop.xlane.xlu1 %1196  ;;  %v3654_v39 = vpop.eup %2390  ;;  %v2120_v47 = vmul.f32 -1.0, %v2104_v25  ;;  %v2077_v42 = vsub.f32 %v2045_v62, %v2061_v63  ;;  %v1215_v6 = vadd.f32 %v1195_v41, %v1151_v0  ;;  %2408 = vrcp.f32 %v2037_v11  ;;  %v1155_v0 = vld [vmem:[#allocation5 + $0x78] sm:$0xff]  ;;  %v1916_v62 = vld [vmem:[#allocation2 + $0x28] sm:$0xff]  ;;  %v1923_v25 = vld [vmem:[#allocation2 + $0x60] sm:$0xff] }
 0x2f9   :  { %v1216_v21 = vadd.f32 %v1197_v33, %v1152_v4  ;;  %v2393_v32 = vpop.eup %2392  ;;  %v2062_v61 = vmul.f32 %v3524_v5, %v1982_v30  ;;  %v2046_v50 = vld [vmem:[#allocation5 + $0x38] sm:$0xff]  ;;  %v1915_v5 = vld [vmem:[#allocation2 + $0x20] sm:$0xff]  ;;  %v2066_v28 = vmul.f32 %v3559_v10, %v1986_v45 }
 0x2fa   :  { %v2047_v20 = vld [vmem:[#allocation5 + $0x40] sm:$0xff]  ;;  %v2395_v31 = vpop.eup %2394  ;;  %2137 = vst.msk [vmem:[%s3736_s6 + $0x8] sm:$0xff] %vm28_vm1, %v2120_v47  ;;  %v1952_v48 = vmul.f32 0.6931472, %v2393_v32  ;;  %v2109_v55 = vmul.f32 %v2385_v16, %v2077_v42  ;;  %1231 = vst.msk [vmem:[#allocation5 + $0x58] sm:$0xff] %vm28_vm1, %v1215_v6 }
 0x2fb   :  { %v2079_v46 = vsub.f32 %v2047_v20, %v2063_v43  ;;  %1232 = vst.msk [vmem:[#allocation5 + $0x60] sm:$0xff] %vm28_vm1, %v1216_v21  ;;  %v2397_v38 = vpop.eup %2396  ;;  %v2078_v17 = vsub.f32 %v2046_v50, %v2062_v61  ;;  %v1199_v57 = vpop.xlane.xlu0 %1198  ;;  %v1972_v16 = vmul.f32 0.6931472, %v2395_v31  ;;  %v2043_v63 = vld [vmem:[#allocation5 + $0x20] sm:$0xff]  ;;  %v1924_v20 = vld [vmem:[#allocation2 + $0x68] sm:$0xff] }
 0x2fc   :  { %v1201_v51 = vpop.xlane.xlu1 %1200  ;;  %v2399_v2 = vpop.eup %2398  ;;  %v1979_v36 = vadd.f32 %v1952_v48, %v1915_v5  ;;  %v2125_v34 = vmul.f32 -1.0, %v2109_v55  ;;  %v1217_v22 = vadd.f32 %v1199_v57, %v1153_v49  ;;  %v2044_v49 = vld [vmem:[#allocation5 + $0x28] sm:$0xff] }
 0x2fd   :  { %v2111_v14 = vmul.f32 %v2389_v9, %v2079_v46  ;;  %v2401_v4 = vpop.eup %2400  ;;  %v1954_v29 = vmul.f32 0.6931472, %v2399_v2  ;;  %v2110_v11 = vmul.f32 %v3591_v12, %v2078_v17  ;;  %v2048_v40 = vld [vmem:[#allocation5 + $0x48] sm:$0xff]  ;;  %v1218_v44 = vadd.f32 %v1201_v51, %v1154_v3  ;;  %v1926_v46 = vld [vmem:[#allocation2 + $0x78] sm:$0xff] }
 0x2fe   :  { %v2049_v35 = vld [vmem:[#allocation5 + $0x50] sm:$0xff]  ;;  %v2059_v56 = vmul.f32 %v3537_v52, %v1979_v36  ;;  %v1968_v10 = vmul.f32 0.6931472, %v2401_v4  ;;  %2142 = vst.msk [vmem:[%s3736_s6 + $0x30] sm:$0xff] %vm28_vm1, %v2125_v34  ;;  %v2080_v60 = vsub.f32 %v2048_v40, %v2064_v8  ;;  %1233 = vst.msk [vmem:[#allocation5 + $0x68] sm:$0xff] %vm28_vm1, %v1217_v22  ;;  %v2403_v23 = vpop.eup %2402  ;;  %v1989_v50 = vadd.f32 %v1972_v16, %v1925_v37 }
 0x2ff   :  { %v2127_v27 = vmul.f32 -1.0, %v2111_v14  ;;  %v1974_v12 = vmul.f32 0.6931472, %v2397_v38  ;;  %v1980_v58 = vadd.f32 %v1954_v29, %v1916_v62  ;;  %v2126_v9 = vmul.f32 -1.0, %v2110_v11  ;;  %1234 = vst.msk [vmem:[#allocation5 + $0x70] sm:$0xff] %vm28_vm1, %v1218_v44  ;;  %v1203_v52 = vpop.xlane.xlu0 %1202 }
 0x300   :  { %v2081_v30 = vsub.f32 %v2049_v35, %v2065_v24  ;;  %v2405_v43 = vpop.eup %2404  ;;  %v2075_v45 = vsub.f32 %v2043_v63, %v2059_v56  ;;  %v2112_v41 = vmul.f32 %v3601_v18, %v2080_v60  ;;  %v1987_v33 = vadd.f32 %v1968_v10, %v1923_v25 }
 0x301   :  { %2144 = vst.msk [vmem:[%s3736_s6 + $0x40] sm:$0xff] %vm28_vm1, %v2127_v27  ;;  %v1219_v47 = vadd.f32 %v1203_v52, %v1155_v0  ;;  %v2060_v42 = vmul.f32 %v3518_v59, %v1980_v58  ;;  %v1970_v6 = vmul.f32 0.6931472, %v2405_v43  ;;  %2143 = vst.msk [vmem:[%s3736_s6 + $0x38] sm:$0xff] %vm28_vm1, %v2126_v9  ;;  %v2050_v32 = vld [vmem:[#allocation5 + $0x58] sm:$0xff]  ;;  %v2407_v59 = vpop.eup %2406  ;;  %v2069_v2 = vmul.f32 %v3621_v13, %v1989_v50 }
 0x302   :  { %v2113_v21 = vmul.f32 %v2403_v23, %v2081_v30  ;;  %v2051_v61 = vld [vmem:[#allocation5 + $0x60] sm:$0xff]  ;;  %v2107_v31 = vmul.f32 %v3612_v53, %v2075_v45  ;;  %v2128_v48 = vmul.f32 -1.0, %v2112_v41  ;;  %v2082_v18 = vsub.f32 %v2050_v32, %v2066_v28  ;;  %v2409_v17 = vpop.eup %2408 }
 0x303   :  { %v2067_v55 = vmul.f32 %v3614_v54, %v1987_v33  ;;  %1235 = vst.msk [vmem:[#allocation5 + $0x78] sm:$0xff] %vm28_vm1, %v1219_v47  ;;  %v2076_v3 = vsub.f32 %v2044_v49, %v2060_v42  ;;  %v1988_v5 = vadd.f32 %v1970_v6, %v1924_v20  ;;  %v1990_v28 = vadd.f32 %v1974_v12, %v1926_v46 }
 0x304   :  { %v2129_v38 = vmul.f32 -1.0, %v2113_v21  ;;  %v2123_v8 = vmul.f32 -1.0, %v2107_v31  ;;  %2145 = vst.msk [vmem:[%s3736_s6 + $0x48] sm:$0xff] %vm28_vm1, %v2128_v48  ;;  %v2114_v53 = vmul.f32 %v3635_v26, %v2082_v18 }
 0x305   :  { %v2083_v24 = vsub.f32 %v2051_v61, %v2067_v55  ;;  %v2108_v54 = vmul.f32 %v3582_v19, %v2076_v3  ;;  %v2068_v57 = vmul.f32 %v3567_v7, %v1988_v5  ;;  %v2052_v51 = vld [vmem:[#allocation5 + $0x68] sm:$0xff]  ;;  %v2070_v0 = vmul.f32 %v3574_v1, %v1990_v28 }
 0x306   :  { %2146 = vst.msk [vmem:[%s3736_s6 + $0x50] sm:$0xff] %vm28_vm1, %v2129_v38  ;;  %2140 = vst.msk [vmem:[%s3736_s6 + $0x20] sm:$0xff] %vm28_vm1, %v2123_v8  ;;  %v2130_v26 = vmul.f32 -1.0, %v2114_v53  ;;  %v2053_v34 = vld [vmem:[#allocation5 + $0x70] sm:$0xff] }
 0x307   :  { %v2115_v36 = vmul.f32 %v2407_v59, %v2083_v24  ;;  %v2124_v14 = vmul.f32 -1.0, %v2108_v54  ;;  %v2084_v19 = vsub.f32 %v2052_v51, %v2068_v57  ;;  %v2085_v22 = vsub.f32 %v2053_v34, %v2069_v2 }
 0x308   :  { %2147 = vst.msk [vmem:[%s3736_s6 + $0x58] sm:$0xff] %vm28_vm1, %v2130_v26 }
 0x309   :  { %v2131_v7 = vmul.f32 -1.0, %v2115_v36  ;;  %2141 = vst.msk [vmem:[%s3736_s6 + $0x28] sm:$0xff] %vm28_vm1, %v2124_v14  ;;  %v2116_v13 = vmul.f32 %v3647_v15, %v2084_v19  ;;  %v2117_v4 = vmul.f32 %v2409_v17, %v2085_v22 }
 0x30a   :  { %v2054_v16 = vld [vmem:[#allocation5 + $0x78] sm:$0xff] }
 0x30b   :  { %2148 = vst.msk [vmem:[%s3736_s6 + $0x60] sm:$0xff] %vm28_vm1, %v2131_v7  ;;  %v2086_v29 = vsub.f32 %v2054_v16, %v2070_v0  ;;  %v2132_v11 = vmul.f32 -1.0, %v2116_v13  ;;  %v2133_v40 = vmul.f32 -1.0, %v2117_v4 }
 0x30d   :  { %v2118_v35 = vmul.f32 %v3654_v39, %v2086_v29  ;;  %2149 = vst.msk [vmem:[%s3736_s6 + $0x68] sm:$0xff] %vm28_vm1, %v2132_v11  ;;  %2150 = vst.msk [vmem:[%s3736_s6 + $0x70] sm:$0xff] %vm28_vm1, %v2133_v40 }
 0x30f   :  { %v2134_v1 = vmul.f32 -1.0, %v2118_v35 }
 0x311   :  { %2151 = vst.msk [vmem:[%s3736_s6 + $0x78] sm:$0xff] %vm28_vm1, %v2134_v1 }

</bundles_post_ra>
